<compile_context>
chip_gen: v5e
topology: v5e:2x2
jax: 0.10.0
libtpu: 0.0.40
codegen_flags: <defaults>
</compile_context>

<pallas_src>
import functools
import math

import numpy as np
import jax
import jax.numpy as jnp
from jax.experimental import pallas as pl
from jax.experimental.pallas import tpu as pltpu

# ---- hyper-parameters (args.* not provided in the reference code) -----------
R = 0.5
WEIGHT_SSIM = 1.0
WEIGHT_GRAD = 1.0
WEIGHT_INTENSITY = 1.0
C1 = 0.01 ** 2
C2 = 0.03 ** 2
WINDOW_SIZE = 11
SIGMA = 1.5
# bf16 MXU operands (f32 accumulation) for the Gaussian SSIM statistics; set to
# jnp.float32 to trade ~3x MXU speed for exact-f32 second moments.
GAUSS_MXU_DTYPE = jnp.bfloat16


# ---- host-side construction of the Gaussian band matrices -------------------
def _band_matrix(n, kern, pad):
    """Banded matrix M so that (M @ x)[i] == sum_k kern[k] * x[i + k - pad]
    with zero padding — PyTorch conv2d 'same' cross-correlation along one axis."""
    m = np.zeros((n, n), np.float32)
    for i in range(n):
        for k, v in enumerate(kern):
            j = i + k - pad
            if 0 <= j < n:
                m[i, j] += float(v)
    return m


def _gaussian_1d(window_size, sigma):
    g = np.array(
        [math.exp(-((x - window_size // 2) ** 2) / (2.0 * sigma ** 2))
         for x in range(window_size)],
        np.float32,
    )
    return g / g.sum()


def _block_diag2(m):
    n = m.shape[0]
    out = np.zeros((2 * n, 2 * n), np.float32)
    out[:n, :n] = m
    out[n:, n:] = m
    return out


def _round_up(x, m):
    return ((x + m - 1) // m) * m


def _vmem_limit(Hp, Wp):
    plane = Hp * Wp * 4
    est = 3 * 2 * plane                       # 3 f32 image inputs, double-buffered
    est += 2 * 2 * (Hp * Hp + Wp * Wp)        # 2 bf16 Gaussian matrices, double-buffered
    est += 44 * plane                         # DWT/Sobel temps, g_in/g_row/gcol, SSIM maps
    try:
        phys = int(pltpu.get_tpu_info().vmem_capacity_bytes)
        if phys < 32 * 1024 * 1024:
            phys = 64 * 1024 * 1024
    except Exception:
        phys = 64 * 1024 * 1024               # conservative (v7x per-core size)
    cap = int(phys * 0.85)                    # leave headroom under physical VMEM
    return int(min(max(int(est * 1.25), 32 * 1024 * 1024), cap))


# ---- the fused Pallas kernel -------------------------------------------------
def _g_content_loss_kernel(ir_ref, vi_ref, fu_ref,      # polyphase-packed (Hp, Wp)
                           gr_ref, gc_ref,               # Gaussian band mats (bf16)
                           out_ref,                      # (1, 128) per-image losses
                           *, h_valid, w_valid, inv_n):
    f32 = jnp.float32
    Hp, Wp = ir_ref.shape
    hp, wp = Hp // 2, Wp // 2
    mm_dt = gr_ref.dtype

    def roll(x, shift, axis):
        return pltpu.roll(x, shift % x.shape[axis], axis)   # keep shift >= 0

    # ---- iota-derived sign / mask / weight maps (tiny VPU work) -------------
    ri = jax.lax.broadcasted_iota(jnp.int32, (Hp, 1), 0)
    ci = jax.lax.broadcasted_iota(jnp.int32, (1, Wp), 1)
    top = ri < hp
    left = ci < wp
    rloc = jnp.where(top, ri, ri - hp)          # row index within a DWT band
    cloc = jnp.where(left, ci, ci - wp)         # col index within a DWT band
    row_sign = jnp.where(top, 1.0, -1.0).astype(f32)
    col_sign = jnp.where(left, 1.0, -1.0).astype(f32)
    # Sobel neighbour masks: kill contributions crossing a band edge (covers the
    # zero-padding edge, the packed-quadrant seam and roll wrap-around).
    m_up = jnp.where(rloc == 0, 0.0, 1.0).astype(f32)
    m_dn = jnp.where(rloc == hp - 1, 0.0, 1.0).astype(f32)
    m_lf = jnp.where(cloc == 0, 0.0, 1.0).astype(f32)
    m_rt = jnp.where(cloc == wp - 1, 0.0, 1.0).astype(f32)
    # Band weights (r^2, r(1-r), r(1-r), (1-r)^2), zeroed on the pad region,
    # with the 1/(B*h*w) mean denominator folded in.
    wmap = (jnp.where(top, R, 1.0 - R) * jnp.where(left, R, 1.0 - R)
            * jnp.where(rloc < h_valid, 1.0, 0.0)
            * jnp.where(cloc < w_valid, 1.0, 0.0)
            * inv_n).astype(f32)

    # ---- Haar DWT: butterfly on the polyphase-packed plane (2 rolls + FMAs) --
    def dwt(pp):
        t = roll(pp, hp, 0) + row_sign * pp
        d = roll(t, wp, 1) + col_sign * t
        return 0.5 * d                         # quadrants [LL LH; HL HH]

    d_ir = dwt(ir_ref[...])
    d_vi = dwt(vi_ref[...])
    d_fu = dwt(fu_ref[...])

    # ---- Intensity loss ------------------------------------------------------
    loss_int = jnp.sum(jnp.abs(d_fu - jnp.maximum(d_ir, d_vi)) * wmap)

    # ---- Gradient loss: separable 3x3 Sobel as roll shift-adds (XLU/VPU) -----
    def sobel(x):
        up = roll(x, 1, 0) * m_up
        dn = roll(x, -1, 0) * m_dn
        vs = up + 2.0 * x + dn                 # vertical taps [1, 2, 1]
        vd = up - dn                           # vertical taps [1, 0, -1]
        sx = roll(vs, -1, 1) * m_rt - roll(vs, 1, 1) * m_lf      # horiz [-1,0,1]
        sy = roll(vd, 1, 1) * m_lf + 2.0 * vd + roll(vd, -1, 1) * m_rt  # [1,2,1]
        return jnp.abs(sx) + jnp.abs(sy)

    grad_joint = jnp.maximum(sobel(d_ir), sobel(d_vi))
    loss_grad = jnp.sum(jnp.abs(d_fu - grad_joint) * wmap)

    # ---- SSIM: 11x11 Gaussian stats — the only MXU work (bf16 ops, f32 acc) --
    gr = gr_ref[...]
    gc = gc_ref[...]
    g_in = jnp.concatenate(
        [d_fu.astype(mm_dt), (d_fu * d_fu).astype(mm_dt),
         d_ir.astype(mm_dt), (d_ir * d_ir).astype(mm_dt), (d_ir * d_fu).astype(mm_dt),
         d_vi.astype(mm_dt), (d_vi * d_vi).astype(mm_dt), (d_vi * d_fu).astype(mm_dt)],
        axis=1)                                               # (Hp, 8*Wp)
    g_row = jnp.dot(gr, g_in, preferred_element_type=f32)     # (Hp, 8*Wp) f32

    def gcol(k):
        return jnp.dot(g_row[:, k * Wp:(k + 1) * Wp].astype(mm_dt), gc,
                       preferred_element_type=f32)

    mu_f, m2_f = gcol(0), gcol(1)
    mu_i, m2_i, m_if = gcol(2), gcol(3), gcol(4)
    mu_v, m2_v, m_vf = gcol(5), gcol(6), gcol(7)

    mu_f_sq = mu_f * mu_f
    sig_f = m2_f - mu_f_sq

    def ssim_map(mu_x, m2_x, m_xf):
        mu_x_sq = mu_x * mu_x
        mu_xf = mu_x * mu_f
        sig_x = m2_x - mu_x_sq
        sig_xf = m_xf - mu_xf
        num = (2.0 * mu_xf + C1) * (2.0 * sig_xf + C2)
        den = (mu_x_sq + mu_f_sq + C1) * (sig_x + sig_f + C2)
        return num * pl.reciprocal(den, approx=True)          # divide on the EUP

    loss_ssim = jnp.sum((ssim_map(mu_i, m2_i, m_if) + ssim_map(mu_v, m2_v, m_vf))
                        * wmap)

    # ---- lane-dense per-image output row: [ssim, intensity, grad, 0, ...] ----
    lane = jax.lax.broadcasted_iota(jnp.int32, (1, 128), 1)
    row = (jnp.where(lane == 0, loss_ssim, 0.0)
           + jnp.where(lane == 1, loss_int, 0.0)
           + jnp.where(lane == 2, loss_grad, 0.0))
    out_ref[...] = row.astype(f32)


# ---- wrapper -----------------------------------------------------------------
def g_content_loss(img_ir, img_vi, img_fusion):
    """Returns (total_loss, SSIM_loss, Intensity_loss, Grad_loss) as scalars."""
    N, C, H, W = img_ir.shape
    assert C == 1, "Sobelxy uses a (1,1,3,3) conv weight => single-channel images"
    assert H % 2 == 0 and W % 2 == 0, "Haar DWT needs even spatial dims"
    B = N * C
    h, w = H // 2, W // 2

    # Pad so each packed DWT band is (mult of 8 sublanes, mult of 128 lanes).
    Hp = _round_up(H, 16)
    Wp = _round_up(W, 256)          # multiple of 128 would already suffice on v5e
    hp, wp = Hp // 2, Wp // 2

    def prep(x):
        x = x.reshape(B, H, W).astype(jnp.float32)
        x = jnp.pad(x, ((0, 0), (0, Hp - H), (0, Wp - W)))
        # polyphase pack: quadrants = (even,even)/(even,odd)/(odd,even)/(odd,odd)
        ee, eo = x[:, 0::2, 0::2], x[:, 0::2, 1::2]
        oe, oo = x[:, 1::2, 0::2], x[:, 1::2, 1::2]
        return jnp.concatenate(
            [jnp.concatenate([ee, eo], axis=2),
             jnp.concatenate([oe, oo], axis=2)], axis=1)       # (B, Hp, Wp)

    ir, vi, fu = prep(img_ir), prep(img_vi), prep(img_fusion)

    # Gaussian (11x11, sigma=1.5) separable band matrices per DWT band,
    # block-diagonal over the two packed quadrants; bf16 MXU operands.
    g1d = _gaussian_1d(WINDOW_SIZE, SIGMA)
    gr = jnp.asarray(_block_diag2(_band_matrix(hp, g1d, WINDOW_SIZE // 2)),
                     GAUSS_MXU_DTYPE)
    gc = jnp.asarray(
        _block_diag2(np.ascontiguousarray(_band_matrix(wp, g1d, WINDOW_SIZE // 2).T)),
        GAUSS_MXU_DTYPE)

    kernel = functools.partial(_g_content_loss_kernel,
                               h_valid=h, w_valid=w,
                               inv_n=1.0 / float(B * h * w))

    img_spec = pl.BlockSpec((None, Hp, Wp), lambda b: (b, 0, 0))
    gr_spec = pl.BlockSpec((Hp, Hp), lambda b: (0, 0))   # constant block => resident
    gc_spec = pl.BlockSpec((Wp, Wp), lambda b: (0, 0))
    out_spec = pl.BlockSpec((None, 1, 128), lambda b: (b, 0, 0))

    grid_spec = pltpu.PrefetchScalarGridSpec(
        num_scalar_prefetch=0,
        grid=(B,),
        in_specs=[img_spec, img_spec, img_spec, gr_spec, gc_spec],
        out_specs=out_spec,
    )

    out = pl.pallas_call(
        kernel,
        out_shape=jax.ShapeDtypeStruct((B, 1, 128), jnp.float32),
        grid_spec=grid_spec,
        compiler_params=pltpu.CompilerParams(
            dimension_semantics=("parallel",),   # independent steps => megacore on v7x
            vmem_limit_bytes=_vmem_limit(Hp, Wp),
        ),
    )(ir, vi, fu, gr, gc)

    sums = jnp.sum(out[:, 0, :3], axis=0)        # per-image partials -> totals
    ssim_loss, int_loss, grad_loss = sums[0], sums[1], sums[2]
    total = (WEIGHT_SSIM * (1.0 - ssim_loss)
             + WEIGHT_GRAD * grad_loss
             + WEIGHT_INTENSITY * int_loss)
    return total, ssim_loss, int_loss, grad_loss


if __name__ == "__main__":
    key = jax.random.PRNGKey(0)
    k1, k2, k3 = jax.random.split(key, 3)
    shape = (2, 1, 16, 16)  # (N, C=1, H, W)
    img_ir = jax.random.uniform(k1, shape, jnp.float32)
    img_vi = jax.random.uniform(k2, shape, jnp.float32)
    img_fu = jax.random.uniform(k3, shape, jnp.float32)

    result = g_content_loss(img_ir, img_vi, img_fu)
    result = jax.block_until_ready(result)
    total, ssim_l, int_l, grad_l = [np.asarray(x) for x in result]
    assert np.isfinite(total) and np.isfinite(ssim_l) and np.isfinite(int_l) and np.isfinite(grad_l)
    print("KERNEL_OK")
</pallas_src>

<mosaic_0001>
module attributes {stable_mosaic.version = 11 : i64} {
  func.func @_g_content_loss_kernel(%arg0: i32, %arg1: memref<1x16x256xf32, #tpu.memory_space<vmem>>, %arg2: memref<1x16x256xf32, #tpu.memory_space<vmem>>, %arg3: memref<1x16x256xf32, #tpu.memory_space<vmem>>, %arg4: memref<16x16xbf16, #tpu.memory_space<vmem>>, %arg5: memref<256x256xbf16, #tpu.memory_space<vmem>>, %arg6: memref<1x1x128xf32, #tpu.memory_space<vmem>>) attributes {dimension_semantics = [#tpu.dimension_semantics<parallel>], iteration_bounds = array<i64: 2>, scalar_prefetch = 0 : i64, scratch_operands = 0 : i64, tpu.core_type = #tpu.core_type<tc>, window_params = [{transform_indices = @transform_0, window_bounds = array<i64: 1, 16, 256>}, {transform_indices = @transform_1, window_bounds = array<i64: 1, 16, 256>}, {transform_indices = @transform_2, window_bounds = array<i64: 1, 16, 256>}, {pipeline_mode = #tpu.pipeline_mode<synchronous>, transform_indices = @transform_3, window_bounds = array<i64: 16, 16>}, {pipeline_mode = #tpu.pipeline_mode<synchronous>, transform_indices = @transform_4, window_bounds = array<i64: 256, 256>}, {transform_indices = @transform_5, window_bounds = array<i64: 1, 1, 128>}]} {
    %0 = tpu.iota {dimensions = array<i32: 0>} : vector<16x1xi32>
    %1 = tpu.iota {dimensions = array<i32: 1>} : vector<1x256xi32>
    %c8_i32 = arith.constant 8 : i32
    %2 = vector.broadcast %c8_i32 : i32 to vector<16x1xi32>
    %3 = arith.cmpi slt, %0, %2 : vector<16x1xi32>
    %c128_i32 = arith.constant 128 : i32
    %4 = vector.broadcast %c128_i32 : i32 to vector<1x256xi32>
    %5 = arith.cmpi slt, %1, %4 : vector<1x256xi32>
    %c8_i32_0 = arith.constant 8 : i32
    %6 = vector.broadcast %c8_i32_0 : i32 to vector<16x1xi32>
    %7 = arith.subi %0, %6 : vector<16x1xi32>
    %8 = arith.select %3, %0, %7 : vector<16x1xi1>, vector<16x1xi32>
    %c128_i32_1 = arith.constant 128 : i32
    %9 = vector.broadcast %c128_i32_1 : i32 to vector<1x256xi32>
    %10 = arith.subi %1, %9 : vector<1x256xi32>
    %11 = arith.select %5, %1, %10 : vector<1x256xi1>, vector<1x256xi32>
    %cst = arith.constant 1.000000e+00 : f32
    %cst_2 = arith.constant -1.000000e+00 : f32
    %12 = vector.broadcast %cst : f32 to vector<16x1xf32>
    %13 = vector.broadcast %cst_2 : f32 to vector<16x1xf32>
    %14 = arith.select %3, %12, %13 : vector<16x1xi1>, vector<16x1xf32>
    %cst_3 = arith.constant 1.000000e+00 : f32
    %cst_4 = arith.constant -1.000000e+00 : f32
    %15 = vector.broadcast %cst_3 : f32 to vector<1x256xf32>
    %16 = vector.broadcast %cst_4 : f32 to vector<1x256xf32>
    %17 = arith.select %5, %15, %16 : vector<1x256xi1>, vector<1x256xf32>
    %c0_i32 = arith.constant 0 : i32
    %18 = vector.broadcast %c0_i32 : i32 to vector<16x1xi32>
    %19 = arith.cmpi eq, %8, %18 : vector<16x1xi32>
    %cst_5 = arith.constant 0.000000e+00 : f32
    %cst_6 = arith.constant 1.000000e+00 : f32
    %20 = vector.broadcast %cst_5 : f32 to vector<16x1xf32>
    %21 = vector.broadcast %cst_6 : f32 to vector<16x1xf32>
    %22 = arith.select %19, %20, %21 : vector<16x1xi1>, vector<16x1xf32>
    %c7_i32 = arith.constant 7 : i32
    %23 = vector.broadcast %c7_i32 : i32 to vector<16x1xi32>
    %24 = arith.cmpi eq, %8, %23 : vector<16x1xi32>
    %cst_7 = arith.constant 0.000000e+00 : f32
    %cst_8 = arith.constant 1.000000e+00 : f32
    %25 = vector.broadcast %cst_7 : f32 to vector<16x1xf32>
    %26 = vector.broadcast %cst_8 : f32 to vector<16x1xf32>
    %27 = arith.select %24, %25, %26 : vector<16x1xi1>, vector<16x1xf32>
    %c0_i32_9 = arith.constant 0 : i32
    %28 = vector.broadcast %c0_i32_9 : i32 to vector<1x256xi32>
    %29 = arith.cmpi eq, %11, %28 : vector<1x256xi32>
    %cst_10 = arith.constant 0.000000e+00 : f32
    %cst_11 = arith.constant 1.000000e+00 : f32
    %30 = vector.broadcast %cst_10 : f32 to vector<1x256xf32>
    %31 = vector.broadcast %cst_11 : f32 to vector<1x256xf32>
    %32 = arith.select %29, %30, %31 : vector<1x256xi1>, vector<1x256xf32>
    %c127_i32 = arith.constant 127 : i32
    %33 = vector.broadcast %c127_i32 : i32 to vector<1x256xi32>
    %34 = arith.cmpi eq, %11, %33 : vector<1x256xi32>
    %cst_12 = arith.constant 0.000000e+00 : f32
    %cst_13 = arith.constant 1.000000e+00 : f32
    %35 = vector.broadcast %cst_12 : f32 to vector<1x256xf32>
    %36 = vector.broadcast %cst_13 : f32 to vector<1x256xf32>
    %37 = arith.select %34, %35, %36 : vector<1x256xi1>, vector<1x256xf32>
    %cst_14 = arith.constant 5.000000e-01 : f32
    %cst_15 = arith.constant 5.000000e-01 : f32
    %38 = vector.broadcast %cst_14 : f32 to vector<16x1xf32>
    %39 = vector.broadcast %cst_15 : f32 to vector<16x1xf32>
    %40 = arith.select %3, %38, %39 : vector<16x1xi1>, vector<16x1xf32>
    %cst_16 = arith.constant 5.000000e-01 : f32
    %cst_17 = arith.constant 5.000000e-01 : f32
    %41 = vector.broadcast %cst_16 : f32 to vector<1x256xf32>
    %42 = vector.broadcast %cst_17 : f32 to vector<1x256xf32>
    %43 = arith.select %5, %41, %42 : vector<1x256xi1>, vector<1x256xf32>
    %44 = vector.broadcast %40 : vector<16x1xf32> to vector<16x256xf32>
    %45 = vector.broadcast %43 : vector<1x256xf32> to vector<16x256xf32>
    %46 = arith.mulf %44, %45 : vector<16x256xf32>
    %c8_i32_18 = arith.constant 8 : i32
    %47 = vector.broadcast %c8_i32_18 : i32 to vector<16x1xi32>
    %48 = arith.cmpi slt, %8, %47 : vector<16x1xi32>
    %cst_19 = arith.constant 1.000000e+00 : f32
    %cst_20 = arith.constant 0.000000e+00 : f32
    %49 = vector.broadcast %cst_19 : f32 to vector<16x1xf32>
    %50 = vector.broadcast %cst_20 : f32 to vector<16x1xf32>
    %51 = arith.select %48, %49, %50 : vector<16x1xi1>, vector<16x1xf32>
    %52 = vector.broadcast %51 : vector<16x1xf32> to vector<16x256xf32>
    %53 = arith.mulf %46, %52 : vector<16x256xf32>
    %c8_i32_21 = arith.constant 8 : i32
    %54 = vector.broadcast %c8_i32_21 : i32 to vector<1x256xi32>
    %55 = arith.cmpi slt, %11, %54 : vector<1x256xi32>
    %cst_22 = arith.constant 1.000000e+00 : f32
    %cst_23 = arith.constant 0.000000e+00 : f32
    %56 = vector.broadcast %cst_22 : f32 to vector<1x256xf32>
    %57 = vector.broadcast %cst_23 : f32 to vector<1x256xf32>
    %58 = arith.select %55, %56, %57 : vector<1x256xi1>, vector<1x256xf32>
    %59 = vector.broadcast %58 : vector<1x256xf32> to vector<16x256xf32>
    %60 = arith.mulf %53, %59 : vector<16x256xf32>
    %cst_24 = arith.constant 7.812500e-03 : f32
    %61 = vector.broadcast %cst_24 : f32 to vector<16x256xf32>
    %62 = arith.mulf %60, %61 : vector<16x256xf32>
    %c0 = arith.constant 0 : index
    %c0_25 = arith.constant 0 : index
    %c0_26 = arith.constant 0 : index
    %63 = vector.load %arg1[%c0, %c0_25, %c0_26] : memref<1x16x256xf32, #tpu.memory_space<vmem>>, vector<1x16x256xf32>
    %64 = vector.shape_cast %63 : vector<1x16x256xf32> to vector<16x256xf32>
    %c8_i32_27 = arith.constant 8 : i32
    %65 = tpu.dynamic_rotate %64 by %c8_i32_27 dim 0 : vector<16x256xf32>, i32 -> vector<16x256xf32>
    %66 = vector.broadcast %14 : vector<16x1xf32> to vector<16x256xf32>
    %67 = arith.mulf %66, %64 : vector<16x256xf32>
    %68 = arith.addf %65, %67 : vector<16x256xf32>
    %c128_i32_28 = arith.constant 128 : i32
    %69 = tpu.dynamic_rotate %68 by %c128_i32_28 dim 1 : vector<16x256xf32>, i32 -> vector<16x256xf32>
    %70 = vector.broadcast %17 : vector<1x256xf32> to vector<16x256xf32>
    %71 = arith.mulf %70, %68 : vector<16x256xf32>
    %72 = arith.addf %69, %71 : vector<16x256xf32>
    %cst_29 = arith.constant 5.000000e-01 : f32
    %73 = vector.broadcast %cst_29 : f32 to vector<16x256xf32>
    %74 = arith.mulf %73, %72 : vector<16x256xf32>
    %c0_30 = arith.constant 0 : index
    %c0_31 = arith.constant 0 : index
    %c0_32 = arith.constant 0 : index
    %75 = vector.load %arg2[%c0_30, %c0_31, %c0_32] : memref<1x16x256xf32, #tpu.memory_space<vmem>>, vector<1x16x256xf32>
    %76 = vector.shape_cast %75 : vector<1x16x256xf32> to vector<16x256xf32>
    %c8_i32_33 = arith.constant 8 : i32
    %77 = tpu.dynamic_rotate %76 by %c8_i32_33 dim 0 : vector<16x256xf32>, i32 -> vector<16x256xf32>
    %78 = vector.broadcast %14 : vector<16x1xf32> to vector<16x256xf32>
    %79 = arith.mulf %78, %76 : vector<16x256xf32>
    %80 = arith.addf %77, %79 : vector<16x256xf32>
    %c128_i32_34 = arith.constant 128 : i32
    %81 = tpu.dynamic_rotate %80 by %c128_i32_34 dim 1 : vector<16x256xf32>, i32 -> vector<16x256xf32>
    %82 = vector.broadcast %17 : vector<1x256xf32> to vector<16x256xf32>
    %83 = arith.mulf %82, %80 : vector<16x256xf32>
    %84 = arith.addf %81, %83 : vector<16x256xf32>
    %cst_35 = arith.constant 5.000000e-01 : f32
    %85 = vector.broadcast %cst_35 : f32 to vector<16x256xf32>
    %86 = arith.mulf %85, %84 : vector<16x256xf32>
    %c0_36 = arith.constant 0 : index
    %c0_37 = arith.constant 0 : index
    %c0_38 = arith.constant 0 : index
    %87 = vector.load %arg3[%c0_36, %c0_37, %c0_38] : memref<1x16x256xf32, #tpu.memory_space<vmem>>, vector<1x16x256xf32>
    %88 = vector.shape_cast %87 : vector<1x16x256xf32> to vector<16x256xf32>
    %c8_i32_39 = arith.constant 8 : i32
    %89 = tpu.dynamic_rotate %88 by %c8_i32_39 dim 0 : vector<16x256xf32>, i32 -> vector<16x256xf32>
    %90 = vector.broadcast %14 : vector<16x1xf32> to vector<16x256xf32>
    %91 = arith.mulf %90, %88 : vector<16x256xf32>
    %92 = arith.addf %89, %91 : vector<16x256xf32>
    %c128_i32_40 = arith.constant 128 : i32
    %93 = tpu.dynamic_rotate %92 by %c128_i32_40 dim 1 : vector<16x256xf32>, i32 -> vector<16x256xf32>
    %94 = vector.broadcast %17 : vector<1x256xf32> to vector<16x256xf32>
    %95 = arith.mulf %94, %92 : vector<16x256xf32>
    %96 = arith.addf %93, %95 : vector<16x256xf32>
    %cst_41 = arith.constant 5.000000e-01 : f32
    %97 = vector.broadcast %cst_41 : f32 to vector<16x256xf32>
    %98 = arith.mulf %97, %96 : vector<16x256xf32>
    %99 = arith.maximumf %74, %86 : vector<16x256xf32>
    %100 = arith.subf %98, %99 : vector<16x256xf32>
    %101 = math.absf %100 : vector<16x256xf32>
    %102 = arith.mulf %101, %62 : vector<16x256xf32>
    %103 = vector.shape_cast %102 : vector<16x256xf32> to vector<1x16x256xf32>
    %cst_42 = arith.constant dense<0.000000e+00> : vector<1xf32>
    %104 = vector.multi_reduction <add>, %103, %cst_42 [1, 2] : vector<1x16x256xf32> to vector<1xf32>
    %105 = vector.shape_cast %104 : vector<1xf32> to vector<1x1x1xf32>
    %106 = vector.extract %105[0, 0, 0] : f32 from vector<1x1x1xf32>
    %c1_i32 = arith.constant 1 : i32
    %107 = tpu.dynamic_rotate %74 by %c1_i32 dim 0 : vector<16x256xf32>, i32 -> vector<16x256xf32>
    %108 = vector.broadcast %22 : vector<16x1xf32> to vector<16x256xf32>
    %109 = arith.mulf %107, %108 : vector<16x256xf32>
    %c15_i32 = arith.constant 15 : i32
    %110 = tpu.dynamic_rotate %74 by %c15_i32 dim 0 : vector<16x256xf32>, i32 -> vector<16x256xf32>
    %111 = vector.broadcast %27 : vector<16x1xf32> to vector<16x256xf32>
    %112 = arith.mulf %110, %111 : vector<16x256xf32>
    %cst_43 = arith.constant 2.000000e+00 : f32
    %113 = vector.broadcast %cst_43 : f32 to vector<16x256xf32>
    %114 = arith.mulf %113, %74 : vector<16x256xf32>
    %115 = arith.addf %109, %114 : vector<16x256xf32>
    %116 = arith.addf %115, %112 : vector<16x256xf32>
    %117 = arith.subf %109, %112 : vector<16x256xf32>
    %c255_i32 = arith.constant 255 : i32
    %118 = tpu.dynamic_rotate %116 by %c255_i32 dim 1 : vector<16x256xf32>, i32 -> vector<16x256xf32>
    %119 = vector.broadcast %37 : vector<1x256xf32> to vector<16x256xf32>
    %120 = arith.mulf %118, %119 : vector<16x256xf32>
    %c1_i32_44 = arith.constant 1 : i32
    %121 = tpu.dynamic_rotate %116 by %c1_i32_44 dim 1 : vector<16x256xf32>, i32 -> vector<16x256xf32>
    %122 = vector.broadcast %32 : vector<1x256xf32> to vector<16x256xf32>
    %123 = arith.mulf %121, %122 : vector<16x256xf32>
    %124 = arith.subf %120, %123 : vector<16x256xf32>
    %c1_i32_45 = arith.constant 1 : i32
    %125 = tpu.dynamic_rotate %117 by %c1_i32_45 dim 1 : vector<16x256xf32>, i32 -> vector<16x256xf32>
    %126 = vector.broadcast %32 : vector<1x256xf32> to vector<16x256xf32>
    %127 = arith.mulf %125, %126 : vector<16x256xf32>
    %cst_46 = arith.constant 2.000000e+00 : f32
    %128 = vector.broadcast %cst_46 : f32 to vector<16x256xf32>
    %129 = arith.mulf %128, %117 : vector<16x256xf32>
    %130 = arith.addf %127, %129 : vector<16x256xf32>
    %c255_i32_47 = arith.constant 255 : i32
    %131 = tpu.dynamic_rotate %117 by %c255_i32_47 dim 1 : vector<16x256xf32>, i32 -> vector<16x256xf32>
    %132 = vector.broadcast %37 : vector<1x256xf32> to vector<16x256xf32>
    %133 = arith.mulf %131, %132 : vector<16x256xf32>
    %134 = arith.addf %130, %133 : vector<16x256xf32>
    %135 = math.absf %124 : vector<16x256xf32>
    %136 = math.absf %134 : vector<16x256xf32>
    %137 = arith.addf %135, %136 : vector<16x256xf32>
    %c1_i32_48 = arith.constant 1 : i32
    %138 = tpu.dynamic_rotate %86 by %c1_i32_48 dim 0 : vector<16x256xf32>, i32 -> vector<16x256xf32>
    %139 = vector.broadcast %22 : vector<16x1xf32> to vector<16x256xf32>
    %140 = arith.mulf %138, %139 : vector<16x256xf32>
    %c15_i32_49 = arith.constant 15 : i32
    %141 = tpu.dynamic_rotate %86 by %c15_i32_49 dim 0 : vector<16x256xf32>, i32 -> vector<16x256xf32>
    %142 = vector.broadcast %27 : vector<16x1xf32> to vector<16x256xf32>
    %143 = arith.mulf %141, %142 : vector<16x256xf32>
    %cst_50 = arith.constant 2.000000e+00 : f32
    %144 = vector.broadcast %cst_50 : f32 to vector<16x256xf32>
    %145 = arith.mulf %144, %86 : vector<16x256xf32>
    %146 = arith.addf %140, %145 : vector<16x256xf32>
    %147 = arith.addf %146, %143 : vector<16x256xf32>
    %148 = arith.subf %140, %143 : vector<16x256xf32>
    %c255_i32_51 = arith.constant 255 : i32
    %149 = tpu.dynamic_rotate %147 by %c255_i32_51 dim 1 : vector<16x256xf32>, i32 -> vector<16x256xf32>
    %150 = vector.broadcast %37 : vector<1x256xf32> to vector<16x256xf32>
    %151 = arith.mulf %149, %150 : vector<16x256xf32>
    %c1_i32_52 = arith.constant 1 : i32
    %152 = tpu.dynamic_rotate %147 by %c1_i32_52 dim 1 : vector<16x256xf32>, i32 -> vector<16x256xf32>
    %153 = vector.broadcast %32 : vector<1x256xf32> to vector<16x256xf32>
    %154 = arith.mulf %152, %153 : vector<16x256xf32>
    %155 = arith.subf %151, %154 : vector<16x256xf32>
    %c1_i32_53 = arith.constant 1 : i32
    %156 = tpu.dynamic_rotate %148 by %c1_i32_53 dim 1 : vector<16x256xf32>, i32 -> vector<16x256xf32>
    %157 = vector.broadcast %32 : vector<1x256xf32> to vector<16x256xf32>
    %158 = arith.mulf %156, %157 : vector<16x256xf32>
    %cst_54 = arith.constant 2.000000e+00 : f32
    %159 = vector.broadcast %cst_54 : f32 to vector<16x256xf32>
    %160 = arith.mulf %159, %148 : vector<16x256xf32>
    %161 = arith.addf %158, %160 : vector<16x256xf32>
    %c255_i32_55 = arith.constant 255 : i32
    %162 = tpu.dynamic_rotate %148 by %c255_i32_55 dim 1 : vector<16x256xf32>, i32 -> vector<16x256xf32>
    %163 = vector.broadcast %37 : vector<1x256xf32> to vector<16x256xf32>
    %164 = arith.mulf %162, %163 : vector<16x256xf32>
    %165 = arith.addf %161, %164 : vector<16x256xf32>
    %166 = math.absf %155 : vector<16x256xf32>
    %167 = math.absf %165 : vector<16x256xf32>
    %168 = arith.addf %166, %167 : vector<16x256xf32>
    %169 = arith.maximumf %137, %168 : vector<16x256xf32>
    %170 = arith.subf %98, %169 : vector<16x256xf32>
    %171 = math.absf %170 : vector<16x256xf32>
    %172 = arith.mulf %171, %62 : vector<16x256xf32>
    %173 = vector.shape_cast %172 : vector<16x256xf32> to vector<1x16x256xf32>
    %cst_56 = arith.constant dense<0.000000e+00> : vector<1xf32>
    %174 = vector.multi_reduction <add>, %173, %cst_56 [1, 2] : vector<1x16x256xf32> to vector<1xf32>
    %175 = vector.shape_cast %174 : vector<1xf32> to vector<1x1x1xf32>
    %176 = vector.extract %175[0, 0, 0] : f32 from vector<1x1x1xf32>
    %c0_57 = arith.constant 0 : index
    %c0_58 = arith.constant 0 : index
    %177 = vector.load %arg4[%c0_57, %c0_58] : memref<16x16xbf16, #tpu.memory_space<vmem>>, vector<16x16xbf16>
    %c0_59 = arith.constant 0 : index
    %c0_60 = arith.constant 0 : index
    %178 = vector.load %arg5[%c0_59, %c0_60] : memref<256x256xbf16, #tpu.memory_space<vmem>>, vector<256x256xbf16>
    %179 = arith.truncf %98 : vector<16x256xf32> to vector<16x256xbf16>
    %180 = arith.mulf %98, %98 : vector<16x256xf32>
    %181 = arith.truncf %180 : vector<16x256xf32> to vector<16x256xbf16>
    %182 = arith.truncf %74 : vector<16x256xf32> to vector<16x256xbf16>
    %183 = arith.mulf %74, %74 : vector<16x256xf32>
    %184 = arith.truncf %183 : vector<16x256xf32> to vector<16x256xbf16>
    %185 = arith.mulf %74, %98 : vector<16x256xf32>
    %186 = arith.truncf %185 : vector<16x256xf32> to vector<16x256xbf16>
    %187 = arith.truncf %86 : vector<16x256xf32> to vector<16x256xbf16>
    %188 = arith.mulf %86, %86 : vector<16x256xf32>
    %189 = arith.truncf %188 : vector<16x256xf32> to vector<16x256xbf16>
    %190 = arith.mulf %86, %98 : vector<16x256xf32>
    %191 = arith.truncf %190 : vector<16x256xf32> to vector<16x256xbf16>
    %192 = tpu.concatenate %179, %181, %182, %184, %186, %187, %189, %191 in 1 : vector<16x256xbf16>, vector<16x256xbf16>, vector<16x256xbf16>, vector<16x256xbf16>, vector<16x256xbf16>, vector<16x256xbf16>, vector<16x256xbf16>, vector<16x256xbf16> -> vector<16x2048xbf16>
    %cst_61 = arith.constant dense<0.000000e+00> : vector<16x2048xf32>
    %193 = tpu.matmul %177, %192, %cst_61 {dimension_numbers = #tpu.dot_dimension_numbers<[1], [0], [0], [1], [0, 0, 1, 1], [], []>} : vector<16x16xbf16>, vector<16x2048xbf16>, vector<16x2048xf32> -> vector<16x2048xf32>
    %194 = vector.extract_strided_slice %193 {offsets = [0, 0], sizes = [16, 256], strides = [1, 1]} : vector<16x2048xf32> to vector<16x256xf32>
    %195 = arith.truncf %194 : vector<16x256xf32> to vector<16x256xbf16>
    %cst_62 = arith.constant dense<0.000000e+00> : vector<16x256xf32>
    %196 = tpu.matmul %195, %178, %cst_62 {dimension_numbers = #tpu.dot_dimension_numbers<[1], [0], [0], [1], [0, 0, 1, 1], [], []>} : vector<16x256xbf16>, vector<256x256xbf16>, vector<16x256xf32> -> vector<16x256xf32>
    %197 = vector.extract_strided_slice %193 {offsets = [0, 256], sizes = [16, 256], strides = [1, 1]} : vector<16x2048xf32> to vector<16x256xf32>
    %198 = arith.truncf %197 : vector<16x256xf32> to vector<16x256xbf16>
    %cst_63 = arith.constant dense<0.000000e+00> : vector<16x256xf32>
    %199 = tpu.matmul %198, %178, %cst_63 {dimension_numbers = #tpu.dot_dimension_numbers<[1], [0], [0], [1], [0, 0, 1, 1], [], []>} : vector<16x256xbf16>, vector<256x256xbf16>, vector<16x256xf32> -> vector<16x256xf32>
    %200 = vector.extract_strided_slice %193 {offsets = [0, 512], sizes = [16, 256], strides = [1, 1]} : vector<16x2048xf32> to vector<16x256xf32>
    %201 = arith.truncf %200 : vector<16x256xf32> to vector<16x256xbf16>
    %cst_64 = arith.constant dense<0.000000e+00> : vector<16x256xf32>
    %202 = tpu.matmul %201, %178, %cst_64 {dimension_numbers = #tpu.dot_dimension_numbers<[1], [0], [0], [1], [0, 0, 1, 1], [], []>} : vector<16x256xbf16>, vector<256x256xbf16>, vector<16x256xf32> -> vector<16x256xf32>
    %203 = vector.extract_strided_slice %193 {offsets = [0, 768], sizes = [16, 256], strides = [1, 1]} : vector<16x2048xf32> to vector<16x256xf32>
    %204 = arith.truncf %203 : vector<16x256xf32> to vector<16x256xbf16>
    %cst_65 = arith.constant dense<0.000000e+00> : vector<16x256xf32>
    %205 = tpu.matmul %204, %178, %cst_65 {dimension_numbers = #tpu.dot_dimension_numbers<[1], [0], [0], [1], [0, 0, 1, 1], [], []>} : vector<16x256xbf16>, vector<256x256xbf16>, vector<16x256xf32> -> vector<16x256xf32>
    %206 = vector.extract_strided_slice %193 {offsets = [0, 1024], sizes = [16, 256], strides = [1, 1]} : vector<16x2048xf32> to vector<16x256xf32>
    %207 = arith.truncf %206 : vector<16x256xf32> to vector<16x256xbf16>
    %cst_66 = arith.constant dense<0.000000e+00> : vector<16x256xf32>
    %208 = tpu.matmul %207, %178, %cst_66 {dimension_numbers = #tpu.dot_dimension_numbers<[1], [0], [0], [1], [0, 0, 1, 1], [], []>} : vector<16x256xbf16>, vector<256x256xbf16>, vector<16x256xf32> -> vector<16x256xf32>
    %209 = vector.extract_strided_slice %193 {offsets = [0, 1280], sizes = [16, 256], strides = [1, 1]} : vector<16x2048xf32> to vector<16x256xf32>
    %210 = arith.truncf %209 : vector<16x256xf32> to vector<16x256xbf16>
    %cst_67 = arith.constant dense<0.000000e+00> : vector<16x256xf32>
    %211 = tpu.matmul %210, %178, %cst_67 {dimension_numbers = #tpu.dot_dimension_numbers<[1], [0], [0], [1], [0, 0, 1, 1], [], []>} : vector<16x256xbf16>, vector<256x256xbf16>, vector<16x256xf32> -> vector<16x256xf32>
    %212 = vector.extract_strided_slice %193 {offsets = [0, 1536], sizes = [16, 256], strides = [1, 1]} : vector<16x2048xf32> to vector<16x256xf32>
    %213 = arith.truncf %212 : vector<16x256xf32> to vector<16x256xbf16>
    %cst_68 = arith.constant dense<0.000000e+00> : vector<16x256xf32>
    %214 = tpu.matmul %213, %178, %cst_68 {dimension_numbers = #tpu.dot_dimension_numbers<[1], [0], [0], [1], [0, 0, 1, 1], [], []>} : vector<16x256xbf16>, vector<256x256xbf16>, vector<16x256xf32> -> vector<16x256xf32>
    %215 = vector.extract_strided_slice %193 {offsets = [0, 1792], sizes = [16, 256], strides = [1, 1]} : vector<16x2048xf32> to vector<16x256xf32>
    %216 = arith.truncf %215 : vector<16x256xf32> to vector<16x256xbf16>
    %cst_69 = arith.constant dense<0.000000e+00> : vector<16x256xf32>
    %217 = tpu.matmul %216, %178, %cst_69 {dimension_numbers = #tpu.dot_dimension_numbers<[1], [0], [0], [1], [0, 0, 1, 1], [], []>} : vector<16x256xbf16>, vector<256x256xbf16>, vector<16x256xf32> -> vector<16x256xf32>
    %218 = arith.mulf %196, %196 : vector<16x256xf32>
    %219 = arith.subf %199, %218 : vector<16x256xf32>
    %220 = arith.mulf %202, %202 : vector<16x256xf32>
    %221 = arith.mulf %202, %196 : vector<16x256xf32>
    %222 = arith.subf %205, %220 : vector<16x256xf32>
    %223 = arith.subf %208, %221 : vector<16x256xf32>
    %cst_70 = arith.constant 2.000000e+00 : f32
    %224 = vector.broadcast %cst_70 : f32 to vector<16x256xf32>
    %225 = arith.mulf %224, %221 : vector<16x256xf32>
    %cst_71 = arith.constant 9.99999974E-5 : f32
    %226 = vector.broadcast %cst_71 : f32 to vector<16x256xf32>
    %227 = arith.addf %225, %226 : vector<16x256xf32>
    %cst_72 = arith.constant 2.000000e+00 : f32
    %228 = vector.broadcast %cst_72 : f32 to vector<16x256xf32>
    %229 = arith.mulf %228, %223 : vector<16x256xf32>
    %cst_73 = arith.constant 8.99999984E-4 : f32
    %230 = vector.broadcast %cst_73 : f32 to vector<16x256xf32>
    %231 = arith.addf %229, %230 : vector<16x256xf32>
    %232 = arith.mulf %227, %231 : vector<16x256xf32>
    %233 = arith.addf %220, %218 : vector<16x256xf32>
    %cst_74 = arith.constant 9.99999974E-5 : f32
    %234 = vector.broadcast %cst_74 : f32 to vector<16x256xf32>
    %235 = arith.addf %233, %234 : vector<16x256xf32>
    %236 = arith.addf %222, %219 : vector<16x256xf32>
    %cst_75 = arith.constant 8.99999984E-4 : f32
    %237 = vector.broadcast %cst_75 : f32 to vector<16x256xf32>
    %238 = arith.addf %236, %237 : vector<16x256xf32>
    %239 = arith.mulf %235, %238 : vector<16x256xf32>
    %240 = tpu.reciprocal %239 {approx = true} : vector<16x256xf32> -> vector<16x256xf32>
    %241 = arith.mulf %232, %240 : vector<16x256xf32>
    %242 = arith.mulf %211, %211 : vector<16x256xf32>
    %243 = arith.mulf %211, %196 : vector<16x256xf32>
    %244 = arith.subf %214, %242 : vector<16x256xf32>
    %245 = arith.subf %217, %243 : vector<16x256xf32>
    %cst_76 = arith.constant 2.000000e+00 : f32
    %246 = vector.broadcast %cst_76 : f32 to vector<16x256xf32>
    %247 = arith.mulf %246, %243 : vector<16x256xf32>
    %cst_77 = arith.constant 9.99999974E-5 : f32
    %248 = vector.broadcast %cst_77 : f32 to vector<16x256xf32>
    %249 = arith.addf %247, %248 : vector<16x256xf32>
    %cst_78 = arith.constant 2.000000e+00 : f32
    %250 = vector.broadcast %cst_78 : f32 to vector<16x256xf32>
    %251 = arith.mulf %250, %245 : vector<16x256xf32>
    %cst_79 = arith.constant 8.99999984E-4 : f32
    %252 = vector.broadcast %cst_79 : f32 to vector<16x256xf32>
    %253 = arith.addf %251, %252 : vector<16x256xf32>
    %254 = arith.mulf %249, %253 : vector<16x256xf32>
    %255 = arith.addf %242, %218 : vector<16x256xf32>
    %cst_80 = arith.constant 9.99999974E-5 : f32
    %256 = vector.broadcast %cst_80 : f32 to vector<16x256xf32>
    %257 = arith.addf %255, %256 : vector<16x256xf32>
    %258 = arith.addf %244, %219 : vector<16x256xf32>
    %cst_81 = arith.constant 8.99999984E-4 : f32
    %259 = vector.broadcast %cst_81 : f32 to vector<16x256xf32>
    %260 = arith.addf %258, %259 : vector<16x256xf32>
    %261 = arith.mulf %257, %260 : vector<16x256xf32>
    %262 = tpu.reciprocal %261 {approx = true} : vector<16x256xf32> -> vector<16x256xf32>
    %263 = arith.mulf %254, %262 : vector<16x256xf32>
    %264 = arith.addf %241, %263 : vector<16x256xf32>
    %265 = arith.mulf %264, %62 : vector<16x256xf32>
    %266 = vector.shape_cast %265 : vector<16x256xf32> to vector<1x16x256xf32>
    %cst_82 = arith.constant dense<0.000000e+00> : vector<1xf32>
    %267 = vector.multi_reduction <add>, %266, %cst_82 [1, 2] : vector<1x16x256xf32> to vector<1xf32>
    %268 = vector.shape_cast %267 : vector<1xf32> to vector<1x1x1xf32>
    %269 = vector.extract %268[0, 0, 0] : f32 from vector<1x1x1xf32>
    %270 = tpu.iota {dimensions = array<i32: 1>} : vector<1x128xi32>
    %c0_i32_83 = arith.constant 0 : i32
    %271 = vector.broadcast %c0_i32_83 : i32 to vector<1x128xi32>
    %272 = arith.cmpi eq, %270, %271 : vector<1x128xi32>
    %cst_84 = arith.constant 0.000000e+00 : f32
    %273 = vector.broadcast %269 : f32 to vector<1x128xf32>
    %274 = vector.broadcast %cst_84 : f32 to vector<1x128xf32>
    %275 = arith.select %272, %273, %274 : vector<1x128xi1>, vector<1x128xf32>
    %c1_i32_85 = arith.constant 1 : i32
    %276 = vector.broadcast %c1_i32_85 : i32 to vector<1x128xi32>
    %277 = arith.cmpi eq, %270, %276 : vector<1x128xi32>
    %cst_86 = arith.constant 0.000000e+00 : f32
    %278 = vector.broadcast %106 : f32 to vector<1x128xf32>
    %279 = vector.broadcast %cst_86 : f32 to vector<1x128xf32>
    %280 = arith.select %277, %278, %279 : vector<1x128xi1>, vector<1x128xf32>
    %281 = arith.addf %275, %280 : vector<1x128xf32>
    %c2_i32 = arith.constant 2 : i32
    %282 = vector.broadcast %c2_i32 : i32 to vector<1x128xi32>
    %283 = arith.cmpi eq, %270, %282 : vector<1x128xi32>
    %cst_87 = arith.constant 0.000000e+00 : f32
    %284 = vector.broadcast %176 : f32 to vector<1x128xf32>
    %285 = vector.broadcast %cst_87 : f32 to vector<1x128xf32>
    %286 = arith.select %283, %284, %285 : vector<1x128xi1>, vector<1x128xf32>
    %287 = arith.addf %281, %286 : vector<1x128xf32>
    %c0_88 = arith.constant 0 : index
    %c0_89 = arith.constant 0 : index
    %c0_90 = arith.constant 0 : index
    %288 = vector.load %arg6[%c0_88, %c0_89, %c0_90] : memref<1x1x128xf32, #tpu.memory_space<vmem>>, vector<1x1x128xf32>
    %289 = vector.shape_cast %288 : vector<1x1x128xf32> to vector<1x128xf32>
    %290 = vector.shape_cast %287 : vector<1x128xf32> to vector<1x1x128xf32>
    tpu.vector_store %arg6[%c0_88, %c0_89, %c0_90], %290 {strides = array<i32>} : memref<1x1x128xf32, #tpu.memory_space<vmem>>, vector<1x1x128xf32>,
    return
  }
  func.func @transform_0(%arg0: i32) -> (i32, i32, i32) {
    %c0_i32 = arith.constant 0 : i32
    %c0_i32_0 = arith.constant 0 : i32
    %c0_i32_1 = arith.constant 0 : i32
    return %arg0, %c0_i32, %c0_i32_0 : i32, i32, i32
  }
  func.func @transform_1(%arg0: i32) -> (i32, i32, i32) {
    %c0_i32 = arith.constant 0 : i32
    %c0_i32_0 = arith.constant 0 : i32
    %c0_i32_1 = arith.constant 0 : i32
    return %arg0, %c0_i32, %c0_i32_0 : i32, i32, i32
  }
  func.func @transform_2(%arg0: i32) -> (i32, i32, i32) {
    %c0_i32 = arith.constant 0 : i32
    %c0_i32_0 = arith.constant 0 : i32
    %c0_i32_1 = arith.constant 0 : i32
    return %arg0, %c0_i32, %c0_i32_0 : i32, i32, i32
  }
  func.func @transform_3(%arg0: i32) -> (i32, i32) {
    %c0_i32 = arith.constant 0 : i32
    %c0_i32_0 = arith.constant 0 : i32
    %c0_i32_1 = arith.constant 0 : i32
    return %c0_i32, %c0_i32_0 : i32, i32
  }
  func.func @transform_4(%arg0: i32) -> (i32, i32) {
    %c0_i32 = arith.constant 0 : i32
    %c0_i32_0 = arith.constant 0 : i32
    %c0_i32_1 = arith.constant 0 : i32
    return %c0_i32, %c0_i32_0 : i32, i32
  }
  func.func @transform_5(%arg0: i32) -> (i32, i32, i32) {
    %c0_i32 = arith.constant 0 : i32
    %c0_i32_0 = arith.constant 0 : i32
    %c0_i32_1 = arith.constant 0 : i32
    return %arg0, %c0_i32, %c0_i32_0 : i32, i32, i32
  }
}

</mosaic_0001>

<bundles_post_ra>
// kernel: tpu_custom_call.1
= control target key start
LH: loop header
LB: loop body
LE: loop exit
PB: predicated region body
PF: predicated region fallthrough
CT: control target
= control target key end

     0   :  { %s3984_s0 = inlined_call_operand.hbm [shape: f32[2,16,256], index: 0, kind: input, shape index: {}]   ;;  %s3985_s1 = inlined_call_operand.hbm [shape: f32[2,16,256], index: 1, kind: input, shape index: {}]   ;;  %s3986_s2 = inlined_call_operand.hbm [shape: f32[2,16,256], index: 2, kind: input, shape index: {}]   ;;  %s3987_s3 = inlined_call_operand.hbm [shape: bf16[16,16], index: 3, kind: input, shape index: {}]   ;;  %s3988_s4 = inlined_call_operand.hbm [shape: bf16[256,256], index: 4, kind: input, shape index: {}]   ;;  %s3989_s5 = inlined_call_operand.hbm [shape: f32[2,1,128], index: 5, kind: output, shape index: {}]  }
   0x1   :  { %4040 = sst [smem:[#allocation43_spill]] %s3985_s1 }
   0x2   :  { %4041 = sst [smem:[#allocation44_spill]] %s3987_s3 }
   0x3   :  { %4042 = sst [smem:[#allocation45_spill]] %s3988_s4 }
   0x4   :  { %10 = vsyncpa [#allocation3], 0 }
   0x5   :  { %12 = vsyncpa [#allocation3 + $0x1], 0 }
   0x6   :  { %13 = vsyncpa [#allocation6], 0 }
   0x7   :  { %15 = vsyncpa [#allocation6 + $0x1], 0 }
   0x8   :  { %16 = vsyncpa [#allocation9], 0 }
   0x9   :  { %17 = vsyncpa [#allocation4], 0 }
   0xa   :  { %19 = vsyncpa [#allocation4 + $0x1], 0  ;;  %s2710_s18 = smov 0   ;;  %s2712_s19 = smov 0  }
   0xb   :  { %s2714_s20 = smov 0   ;;  %s2716_s21 = smov 0  }
   0xc LB: > { %4043 = sst [smem:[#allocation16_spill]] %s2666_s21  ;;  %s2731_s22 = sadd.s32 4294967295, %s2666_s21   ;;  %s2666_s21 = sphi %s2716_s21, %s4127_s21   ;;  %s2662_s20 = sphi %s2714_s20, %s4131_s20   ;;  %s2658_s19 = sphi %s2712_s19, %s4130_s19   ;;  %s2654_s18 = sphi %s2710_s18, %s4129_s18  }
   0xd   : > { %s2125_s23 = sadd.s32 4294967294, %s2666_s21   ;;  %p45_p0 = scmp.ne.s32.totalorder %s2658_s19, %s2654_s18 }
   0xe   : > { %p3994_p1 = scmp.eq.s32.totalorder %s2731_s22, 0  ;;  %p163_p2 = scmp.eq.s32.totalorder %s2731_s22, 1 }
   0xf   : > { %p169_p3 = scmp.eq.s32.totalorder %s2125_s23, 1  ;;  %p2126_p5 = scmp.ge.s32.totalorder %s2666_s21, 1 }
  0x10   : > { %p2740_p4 = por %p3994_p1, %p45_p0  ;;  %p176_p7 = scmp.lt.s32.totalorder %s2666_s21, 3 }
  0x11   : > { %p2745_p6 = por %p169_p3, %p45_p0  ;;  %s4047_s3 = sld [smem:[#allocation44_spill]] }
  0x12   : > { %p2753_p8 = pnand %p2126_p5, %p176_p7  ;;  %s2668_s30 = smov [#allocation8]  }
  0x13   : > { %s4045_s25 = scalar_select %p2745_p6, 1, 0 }
  0x14   : > { %p2355_p9 = pneg %p2753_p8  ;;  %s189_s6 = sshll.u32 %s2668_s30, 4  ;;  %s190_s6 = int_to_ptr.vmem [resolvable:$true] %s189_s6 }
  0x15   : > { %4046 = sst [smem:[#allocation17_spill]] %s4045_s25  ;;  %s2767_s8 = sadd.s32 1, %s2666_s21  }
  0x16   : > { %p2761_p10 = pnand %p2355_p9, %p3994_p1  ;;  %4050 = sst [smem:[#allocation18_spill]] %s2767_s8 }
  0x17   : > { %s187_s28 = sshll.u32 %s4047_s3, 4  ;;  %s2669_s9 = smov 64   ;;  %s188_s28 = int_to_ptr.hbm [resolvable:$true] %s187_s28 }
  0x18   : > { %s2670_s10 = smov 4   ;;  %s29_s11 = ssub.s32 %s2666_s21, %s2767_s8 }
  0x19   : > { %2358 = dma.hbm_to_vmem [thread:$0]  (!%p2761_p10), %s188_s28, 128, %s190_s6, [#allocation9], %s2669_s9, %s2669_s9, %s2670_s10  }
  0x1a   : > { %s32_s12 = sadd.s32 1, %s2662_s20  ;;  %p30_p12 = scmp.eq.s32.totalorder %s29_s11, 0 }
  0x1b   : > { %p39_p13 = scmp.ne.s32.totalorder %s2662_s20, %s2658_s19  ;;  %p40_p0 = scmp.eq.s32.totalorder %s2666_s21, 0 }
  0x1c   : > { %p2378_p3 = scmp.lt.s32.totalorder %s2666_s21, 2  ;;  %s3990_s15 = sand.u32 1, %s2662_s20  }
  0x1d   : > { %s2779_s13 = scalar_select %p30_p12, %s2662_s20, %s32_s12  }
  0x1e   : > { %p41_p5 = por %p40_p0, %p39_p13  ;;  %p2783_p7 = por %p163_p2, %p39_p13 }
  0x1f   : > { %4051 = sst [smem:[#allocation19_spill]] %s2779_s13  ;;  %s2789_s16 = sshll.u32 %s2666_s21, 5 }
  0x20   : > { %s2793_s17 = sshll.u32 %s3990_s15, 5  ;;  %p2795_p9 = pnand %p2378_p3, %p41_p5 }
  0x21   : > { %s239_s26 = sand.u32 1, %s2666_s21   ;;  %s4054_s1 = sld [smem:[#allocation43_spill]] }
  0x22   : > { %s243_s6 = scalar_lea.vmem [#allocation5], %s2793_s17  ;;  %s4055_s4 = sld [smem:[#allocation45_spill]] }
  0x23   : > { %s251_s9 = sshll.u32 %s243_s6, 4  ;;  %s2808_s3 = scalar_lea.sflag [#allocation6], %s239_s26  ;;  %s252_s9 = int_to_ptr.vmem [resolvable:$true] %s251_s9 }
  0x24   : > { %p2476_p12 = pneg %p2795_p9 }
  0x27   : > { %s248_s30 = scalar_lea.hbm %s4054_s1, %s2789_s16 }
  0x28   : > { %s249_s10 = sshll.u32 %s248_s30, 4  ;;  %s201_s15 = sshll.u32 %s4055_s4, 4  ;;  %s250_s10 = int_to_ptr.hbm [resolvable:$true] %s249_s10  ;;  %s202_s15 = int_to_ptr.hbm [resolvable:$true] %s201_s15 }
  0x29   : > { %s2472_s13 = sshra.s32 %s250_s10, 4  ;;  %s2479_s30 = scalar_lea.hbm %s4054_s1, 64  ;;  %s2473_s13 = int_to_ptr.hbm [resolvable:$true] %s2472_s13 }
  0x2a   : > { %s2474_s8 = scalar_lea.hbm %s2473_s13, 32  ;;  %p2480_p3 = scmp.lt.s32.totalorder %s2473_s13, %s4054_s1 }
  0x2b   : > { %p2475_p2 = scmp.ne.s32.totalorder %s2473_s13, %s2474_s8  ;;  %p2481_p5 = scmp.lt.s32.totalorder %s2479_s30, %s2474_s8 }
  0x2d   : > { %p2477_p13 = pnand %p2476_p12, %p2475_p2  ;;  %p2482_p11 = por %p2481_p5, %p2480_p3 }
  0x2f   : > { %p2478_p0 = pneg %p2477_p13 }
  0x31   : > { %p2483_p1 = pnand %p2482_p11, %p2478_p0 }
  0x33   : > { %2486 = shalt.err (!%p2483_p1)
}
  0x34   : > { %s2671_s26 = smov 256   ;;  %s2672_s11 = smov 16  }
  0x35   : > { %2368 = dma.hbm_to_vmem [thread:$0]  (!%p2795_p9), %s250_s10, 512, %s252_s9, %s2808_s3, %s2671_s26, %s2671_s26, %s2672_s11  }
  0x36   : > { %s2673_s21 = smov [#allocation10]   ;;  %s2674_s8 = smov 128  }
  0x37   : > { %s203_s13 = sshll.u32 %s2673_s21, 4  ;;  %s2675_s12 = smov 8   ;;  %s204_s13 = int_to_ptr.vmem [resolvable:$true] %s203_s13 }
  0x38   : > { %2361 = dma.hbm_to_vmem [thread:$0]  (!%p2761_p10), %s202_s15, 4096, %s204_s13, [#allocation9], %s2674_s8, %s2674_s8, %s2675_s12  }
  0x39   : > { %s226_s30 = scalar_lea.hbm %s3984_s0, %s2789_s16  ;;  %s221_s6 = scalar_lea.vmem [#allocation2], %s2793_s17 }
  0x3a   : > { %s229_s1 = sshll.u32 %s221_s6, 4  ;;  %s227_s4 = sshll.u32 %s226_s30, 4  ;;  %s230_s1 = int_to_ptr.vmem [resolvable:$true] %s229_s1  ;;  %s228_s4 = int_to_ptr.hbm [resolvable:$true] %s227_s4 }
  0x3b   : > { %s4056_s25 = sand.u32 1, %s2662_s20   ;;  %s2532_s10 = sshra.s32 %s228_s4, 4  ;;  %s2533_s10 = int_to_ptr.hbm [resolvable:$true] %s2532_s10 }
  0x3c   : > { %s218_s9 = scalar_lea.sflag [#allocation3], %s4056_s25  ;;  %s2534_s21 = scalar_lea.hbm %s2533_s10, 32 }
  0x3d   : > { %p2535_p1 = scmp.ne.s32.totalorder %s2533_s10, %s2534_s21  ;;  %s2539_s13 = scalar_lea.hbm %s3984_s0, 64 }
  0x3e   : > { %p2540_p10 = scmp.lt.s32.totalorder %s2533_s10, %s3984_s0  ;;  %p2541_p13 = scmp.lt.s32.totalorder %s2539_s13, %s2534_s21 }
  0x3f   : > { %p2537_p11 = pnand %p2535_p1, %p2476_p12 }
  0x40   : > { %p2542_p0 = por %p2541_p13, %p2540_p10 }
  0x41   : > { %p2538_p2 = pneg %p2537_p11 }
  0x43   : > { %p2543_p3 = pnand %p2542_p0, %p2538_p2 }
  0x45   : > { %2546 = shalt.err (!%p2543_p3)
}
  0x46   : > { %2365 = dma.hbm_to_vmem [thread:$0]  (!%p2795_p9), %s228_s4, 512, %s230_s1, %s218_s9, %s2671_s26, %s2671_s26, %s2672_s11  }
  0x47   : > { %s270_s28 = scalar_lea.hbm %s3986_s2, %s2789_s16  ;;  %s265_s30 = scalar_lea.vmem [#allocation7], %s2793_s17 }
  0x48   : > { %s273_s6 = sshll.u32 %s265_s30, 4  ;;  %s271_s10 = sshll.u32 %s270_s28, 4  ;;  %s274_s6 = int_to_ptr.vmem [resolvable:$true] %s273_s6  ;;  %s272_s10 = int_to_ptr.hbm [resolvable:$true] %s271_s10 }
  0x49   : > { %s2562_s21 = sshra.s32 %s272_s10, 4  ;;  %s2569_s1 = scalar_lea.hbm %s3986_s2, 64  ;;  %s2563_s21 = int_to_ptr.hbm [resolvable:$true] %s2562_s21 }
  0x4a   : > { %s2564_s7 = scalar_lea.hbm %s2563_s21, 32  ;;  %p2570_p2 = scmp.lt.s32.totalorder %s2563_s21, %s3986_s2 }
  0x4b   : > { %p2565_p5 = scmp.ne.s32.totalorder %s2563_s21, %s2564_s7  ;;  %p2571_p10 = scmp.lt.s32.totalorder %s2569_s1, %s2564_s7 }
  0x4d   : > { %p2567_p1 = pnand %p2565_p5, %p2476_p12  ;;  %p2572_p13 = por %p2571_p10, %p2570_p2 }
  0x4f   : > { %p2568_p11 = pneg %p2567_p1 }
  0x51   : > { %p2573_p0 = pnand %p2572_p13, %p2568_p11 }
  0x53   : > { %2576 = shalt.err (!%p2573_p0)
}
  0x54   : > { %2371 = dma.hbm_to_vmem [thread:$0]  (!%p2795_p9), %s272_s10, 512, %s274_s6, %s2808_s3, %s2671_s26, %s2671_s26, %s2672_s11  }
  0x55   : > { %285 = sbr.rel (%p2753_p8) target bundleno = 796 (0x31c), region = 40 }
  0x5a   : > { %s2873_s16 = sand.u32 1, %s2658_s19  }
  0x5b   : > { %s2140_s17 = sshll.u32 %s2873_s16, 5  ;;  %s288_s8 = scalar_lea.sflag [#allocation3], %s2873_s16 }
  0x5c   : > { %s291_s12 = scalar_lea.vmem [#allocation2], %s2140_s17 }
  0x5d   : > { %2637 = dma.done.wait (%p2740_p4), %s288_s8, 512  }
  0x5e   : > { %2639 = vsyncadd (%p2740_p4), %s288_s8, 4294966784  ;;  %s297_s3 = sand.u32 1, %s2731_s22   ;;  %s2882_s29 = scalar_lea.vmem [#allocation5], %s2140_s17 }
  0x5f   : > { %s298_s23 = scalar_lea.sflag [#allocation6], %s297_s3 }
  0x60   : > { %2641 = dma.done.wait (%p2740_p4), %s298_s23, 1024  }
  0x61   : > { %2643 = vsyncadd (%p2740_p4), %s298_s23, 4294966272  ;;  %s311_s26 = scalar_lea.vmem [#allocation7], %s2140_s17  ;;  %p4057_p8 = scmp.eq.s32.totalorder %s2731_s22, 0 }
  0x63   : > { %2645 = dma.done.wait (%p4057_p8), [#allocation9], 4224   ;;  %p4058_p9 = pmov %p4057_p8 }
  0x64   : > { %v461_v0 = vld [vmem:[%s311_s26] sm:$0xff]  ;;  %v462_v1 = vld [vmem:[%s311_s26 + $0x8] sm:$0xff]  ;;  %v463_v2 = vld [vmem:[%s311_s26 + $0x10] sm:$0xff]  ;;  %vm964_vm0 = vcmask 130048   ;;  %s2677_s24 = smov 1   ;;  %s2678_s11 = smov 127  }
  0x65   : > { %2647 = vsyncadd (%p4058_p9), [#allocation9], 4294963072  ;;  %v464_v3 = vld [vmem:[%s311_s26 + $0x18] sm:$0xff]  ;;  %v467_v4 = vmul.f32 -1.0, %v463_v2  ;;  %v469_v5 = vadd.f32 %v463_v2, %v461_v0  ;;  %v413_v6 = vld [vmem:[%s291_s12] sm:$0xff]  ;;  %s1993_s6 = scalar_lea.hbm %s3989_s5, %s2731_s22  ;;  %s357_s21 = scalar_lea.vmem [#allocation11], %s2873_s16 }
  0x66   : > { %v468_v7 = vmul.f32 -1.0, %v464_v3  ;;  %v470_v8 = vadd.f32 %v464_v3, %v462_v1  ;;  %v414_v9 = vld [vmem:[%s291_s12 + $0x8] sm:$0xff]  ;;  %v415_v10 = vld [vmem:[%s291_s12 + $0x10] sm:$0xff]  ;;  %v416_v11 = vld [vmem:[%s291_s12 + $0x18] sm:$0xff]  ;;  %s1995_s7 = sshll.u32 %s357_s21, 4  ;;  %s1997_s15 = sshll.u32 %s1993_s6, 4  ;;  %s1996_s7 = int_to_ptr.vmem [resolvable:$true] %s1995_s7  ;;  %s1998_s15 = int_to_ptr.hbm [resolvable:$true] %s1997_s15 }
  0x67   : > { %v471_v12 = vadd.f32 %v467_v4, %v461_v0  ;;  %v419_v13 = vmul.f32 -1.0, %v415_v10  ;;  %v420_v14 = vmul.f32 -1.0, %v416_v11  ;;  %v421_v15 = vadd.f32 %v415_v10, %v413_v6  ;;  %v439_v62 = vld [vmem:[%s2882_s29 + $0x10] sm:$0xff]  ;;  %v440_v3 = vld [vmem:[%s2882_s29 + $0x18] sm:$0xff]  ;;  %v2934_v4 = vld [vmem:[#allocation8] sm:$0xff]  ;;  %s1985_s22 = scalar_lea.sflag [#allocation4], %s2873_s16 }
  0x68   : > { %v472_v16 = vadd.f32 %v468_v7, %v462_v1  ;;  %v474_v17 = vmul.f32 -1.0, %v470_v8  ;;  %v477_v18 = vadd.f32 %v470_v8, %v469_v5  ;;  %v422_v19 = vadd.f32 %v416_v11, %v414_v9  ;;  %v438_v10 = vld [vmem:[%s2882_s29 + $0x8] sm:$0xff]  ;;  %s2606_s13 = sshra.s32 %s1998_s15, 4  ;;  %s2612_s17 = scalar_lea.hbm %s3989_s5, 2  ;;  %s2607_s13 = int_to_ptr.hbm [resolvable:$true] %s2606_s13 }
  0x69   : > { %v423_v20 = vadd.f32 %v419_v13, %v413_v6  ;;  %v424_v21 = vadd.f32 %v420_v14, %v414_v9  ;;  %v437_v9 = vld [vmem:[%s2882_s29] sm:$0xff]  ;;  %v443_v14 = vmul.f32 -1.0, %v439_v62  ;;  %s2608_s1 = scalar_lea.hbm %s2607_s13, 1  ;;  %p2613_p5 = scmp.lt.s32.totalorder %s2607_s13, %s3989_s5 }
  0x6a   : > { %v476_v22 = vmul.f32 -1.0, %v472_v16  ;;  %v478_v23 = vadd.f32 %v474_v17, %v469_v5  ;;  %v479_v24 = vadd.f32 %v472_v16, %v471_v12  ;;  %v2892_v25 = vmul.f32 0.5, %v477_v18  ;;  %p2609_p4 = scmp.ne.s32.totalorder %s2607_s13, %s2608_s1  ;;  %p2614_p1 = scmp.lt.s32.totalorder %s2612_s17, %s2608_s1 }
  0x6b   : > { %v426_v26 = vmul.f32 -1.0, %v422_v19  ;;  %v428_v27 = vmul.f32 -1.0, %v424_v21  ;;  %v429_v28 = vadd.f32 %v422_v19, %v421_v15  ;;  %v431_v29 = vadd.f32 %v424_v21, %v423_v20 }
  0x6c   : > { %4059 = vst [vmem:[#allocation20_spill] sm:$0xff] %v2892_v25  ;;  %v480_v30 = vadd.f32 %v476_v22, %v471_v12  ;;  %v2894_v31 = vmul.f32 0.5, %v478_v23  ;;  %v2896_v32 = vmul.f32 0.5, %v479_v24  ;;  %v845_v33 = vmul.f32 %v2892_v25, %v2892_v25  ;;  %p2610_p12 = pnand %p2609_p4, %p2783_p7  ;;  %p2615_p11 = por %p2614_p1, %p2613_p5 }
  0x6d   : > { %v430_v34 = vadd.f32 %v426_v26, %v421_v15  ;;  %v432_v35 = vadd.f32 %v428_v27, %v423_v20  ;;  %v2900_v36 = vmul.f32 0.5, %v429_v28  ;;  %v2902_v37 = vmul.f32 0.5, %v431_v29 }
  0x6e   : > { %4060 = vst [vmem:[#allocation21_spill] sm:$0xff] %v2894_v31  ;;  %v2904_v38 = vmul.f32 0.5, %v480_v30  ;;  %v843_v39 = vpack.c.bf16 %v2894_v31, %v2892_v25  ;;  %v846_v40 = vmul.f32 %v2894_v31, %v2894_v31  ;;  %v847_v41 = vmul.f32 %v2896_v32, %v2896_v32  ;;  %p2611_p3 = pneg %p2610_p12 }
  0x6f   : > { %4061 = vst [vmem:[#allocation22_spill] sm:$0xff] %v2896_v32  ;;  %v2912_v42 = vmul.f32 0.5, %v430_v34  ;;  %v2914_v43 = vmul.f32 0.5, %v432_v35  ;;  %v853_v44 = vmul.f32 %v2900_v36, %v2900_v36  ;;  %v855_v45 = vmul.f32 %v2902_v37, %v2902_v37 }
  0x70   : > { %4062 = vst [vmem:[#allocation23_spill] sm:$0xff] %v2900_v36  ;;  %v844_v46 = vpack.c.bf16 %v2904_v38, %v2896_v32  ;;  %v881_v47 = vunpack.c.l.b16 %v843_v39  ;;  %v882_v48 = vunpack.c.h.b16 %v843_v39  ;;  %v848_v49 = vmul.f32 %v2904_v38, %v2904_v38  ;;  %p2616_p2 = pnand %p2615_p11, %p2611_p3 }
  0x71   : > { %4063 = vst [vmem:[#allocation24_spill] sm:$0xff] %v2902_v37  ;;  %v849_v50 = vpack.c.bf16 %v846_v40, %v845_v33  ;;  %v851_v51 = vpack.c.bf16 %v2912_v42, %v2900_v36  ;;  %v852_v52 = vpack.c.bf16 %v2914_v43, %v2902_v37  ;;  %v854_v53 = vmul.f32 %v2912_v42, %v2912_v42 }
  0x72   : > { %4064 = vst [vmem:[#allocation25_spill] sm:$0xff] %v2904_v38  ;;  %v883_v54 = vunpack.c.l.b16 %v844_v46  ;;  %v884_v55 = vunpack.c.h.b16 %v844_v46  ;;  %v850_v56 = vpack.c.bf16 %v848_v49, %v847_v41  ;;  %v856_v57 = vmul.f32 %v2914_v43, %v2914_v43 }
  0x73   : > { %4065 = vst [vmem:[#allocation26_spill] sm:$0xff] %v2912_v42  ;;  %v891_v58 = vunpack.c.l.b16 %v849_v50  ;;  %v892_v59 = vunpack.c.h.b16 %v849_v50  ;;  %v901_v60 = vunpack.c.l.b16 %v851_v51  ;;  %v903_v61 = vunpack.c.l.b16 %v852_v52 }
  0x74   : > { %4066 = vst [vmem:[#allocation27_spill] sm:$0xff] %v2914_v43  ;;  %v885_v63 = vpack.c.b16 %v883_v54, %v881_v47  ;;  %v886_v0 = vpack.c.b16 %v884_v55, %v882_v48  ;;  %v893_v1 = vunpack.c.l.b16 %v850_v56  ;;  %v894_v2 = vunpack.c.h.b16 %v850_v56 }
  0x75   : > { %v905_v5 = vpack.c.b16 %v903_v61, %v901_v60  ;;  %v902_v6 = vunpack.c.h.b16 %v851_v51  ;;  %v904_v7 = vunpack.c.h.b16 %v852_v52  ;;  %v857_v8 = vpack.c.bf16 %v854_v53, %v853_v44 }
  0x76   : > { %975 = vmatpush.bf16.msra.mxu0 %v885_v63  ;;  %989 = vmatpush.bf16.msra.mxu1 %v886_v0  ;;  %v895_v11 = vpack.c.b16 %v893_v1, %v891_v58  ;;  %v896_v12 = vpack.c.b16 %v894_v2, %v892_v59  ;;  %v858_v13 = vpack.c.bf16 %v856_v57, %v855_v45  ;;  %v444_v18 = vmul.f32 -1.0, %v440_v3 }
  0x77   : > { %v906_v15 = vpack.c.b16 %v904_v7, %v902_v6  ;;  %v911_v16 = vunpack.c.l.b16 %v857_v8  ;;  %v912_v17 = vunpack.c.h.b16 %v857_v8  ;;  %v445_v21 = vadd.f32 %v439_v62, %v437_v9 }
  0x78   : > { %1003 = vmatpush.bf16.msra.mxu2 %v895_v11  ;;  %1017 = vmatpush.bf16.msra.mxu3 %v896_v12  ;;  %v913_v19 = vunpack.c.l.b16 %v858_v13  ;;  %v914_v20 = vunpack.c.h.b16 %v858_v13  ;;  %v446_v22 = vadd.f32 %v440_v3, %v438_v10  ;;  %v447_v23 = vadd.f32 %v443_v14, %v437_v9 }
  0x79   : > { %2151 = vmatmul.msk.bf16.vlgmr.msra.gmra.mxu0 %vm964_vm0, %v2934_v4  ;;  %2152 = vmatmul.msk.bf16.vlgmr.msra.gmra.mxu1 %vm964_vm0, %v2934_v4  ;;  %v448_v24 = vadd.f32 %v444_v18, %v438_v10  ;;  %v859_v34 = vmul.f32 %v2892_v25, %v2900_v36  ;;  %v860_v35 = vmul.f32 %v2894_v31, %v2912_v42 }
  0x7a   : > { %1031 = vmatpush.bf16.msrb.mxu0 %v905_v5  ;;  %1045 = vmatpush.bf16.msrb.mxu1 %v906_v15  ;;  %v915_v26 = vpack.c.b16 %v913_v19, %v911_v16  ;;  %v916_v27 = vpack.c.b16 %v914_v20, %v912_v17  ;;  %v450_v28 = vmul.f32 -1.0, %v446_v22  ;;  %v453_v29 = vadd.f32 %v446_v22, %v445_v21 }
  0x7b   : > { %2153 = vmatmul.msk.bf16.vlgmr.msra.gmra.mxu2 %vm964_vm0, %v2934_v4  ;;  %2154 = vmatmul.msk.bf16.vlgmr.msra.gmra.mxu3 %vm964_vm0, %v2934_v4  ;;  %v452_v30 = vmul.f32 -1.0, %v448_v24  ;;  %v455_v33 = vadd.f32 %v448_v24, %v447_v23  ;;  %v861_v41 = vmul.f32 %v2896_v32, %v2902_v37  ;;  %v862_v44 = vmul.f32 %v2904_v38, %v2914_v43 }
  0x7c   : > { %1059 = vmatpush.bf16.msrb.mxu2 %v915_v26  ;;  %1073 = vmatpush.bf16.msrb.mxu3 %v916_v27  ;;  %v454_v39 = vadd.f32 %v450_v28, %v445_v21  ;;  %v2950_v40 = vmul.f32 0.5, %v453_v29  ;;  %v863_v47 = vpack.c.bf16 %v860_v35, %v859_v34  ;;  %v2225_v27 = vld [vmem:[#allocation10 + $0x70] sm:$0xf]  ;;  %v2316_v28 = vld [vmem:[#allocation10 + $0x74] sm:$0xf0] }
  0x7d   : > { %v456_v45 = vadd.f32 %v452_v30, %v447_v23  ;;  %v2956_v46 = vmul.f32 0.5, %v455_v33  ;;  %v864_v49 = vpack.c.bf16 %v862_v44, %v861_v41  ;;  %v2289_v29 = vld [vmem:[#allocation10 + $0xf0] sm:$0xf]  ;;  %v2332_v30 = vld [vmem:[#allocation10 + $0xf4] sm:$0xf0]  ;;  %v2990_v41 = vor.u32 %v2316_v28, %v2225_v27 }
  0x7e   : > { %4067 = vst [vmem:[#allocation28_spill] sm:$0xff] %v2950_v40  ;;  %v2958_v48 = vmul.f32 0.5, %v454_v39  ;;  %v867_v50 = vmul.f32 %v2950_v40, %v2950_v40  ;;  %v873_v51 = vmul.f32 %v2892_v25, %v2950_v40  ;;  %v921_v53 = vunpack.c.l.b16 %v863_v47  ;;  %v2315_v33 = vld [vmem:[#allocation10 + $0x74] sm:$0xf]  ;;  %v2227_v34 = vld [vmem:[#allocation10 + $0x78] sm:$0xf0] }
  0x7f   : > { %4068 = vst [vmem:[#allocation29_spill] sm:$0xff] %v2956_v46  ;;  %v2964_v52 = vmul.f32 0.5, %v456_v45  ;;  %v922_v54 = vunpack.c.h.b16 %v863_v47  ;;  %v869_v55 = vmul.f32 %v2956_v46, %v2956_v46  ;;  %v923_v57 = vunpack.c.l.b16 %v864_v49  ;;  %v2331_v35 = vld [vmem:[#allocation10 + $0xf4] sm:$0xf]  ;;  %v2291_v39 = vld [vmem:[#allocation10 + $0xf8] sm:$0xf0] }
  0x80   : > { %4069 = vst [vmem:[#allocation30_spill] sm:$0xff] %v2958_v48  ;;  %v865_v56 = vpack.c.bf16 %v2958_v48, %v2950_v40  ;;  %v924_v58 = vunpack.c.h.b16 %v864_v49  ;;  %v868_v59 = vmul.f32 %v2958_v48, %v2958_v48  ;;  %v874_v62 = vmul.f32 %v2894_v31, %v2958_v48  ;;  %v2217_v45 = vld [vmem:[#allocation10 + $0x60] sm:$0xf]  ;;  %v2314_v47 = vld [vmem:[#allocation10 + $0x64] sm:$0xf0] }
  0x81   : > { %4070 = vst [vmem:[#allocation31_spill] sm:$0xff] %v2964_v52  ;;  %v866_v60 = vpack.c.bf16 %v2964_v52, %v2956_v46  ;;  %v870_v61 = vmul.f32 %v2964_v52, %v2964_v52  ;;  %v875_v63 = vmul.f32 %v2896_v32, %v2956_v46  ;;  %v925_v2 = vpack.c.b16 %v923_v57, %v921_v53  ;;  %v2281_v49 = vld [vmem:[#allocation10 + $0xe0] sm:$0xf]  ;;  %v2283_v57 = vld [vmem:[#allocation10 + $0xe8] sm:$0xf0] }
  0x82   : > { %v931_v0 = vunpack.c.l.b16 %v865_v56  ;;  %v932_v1 = vunpack.c.h.b16 %v865_v56  ;;  %v926_v3 = vpack.c.b16 %v924_v58, %v922_v54  ;;  %v871_v7 = vpack.c.bf16 %v868_v59, %v867_v50  ;;  %v2330_v50 = vld [vmem:[#allocation10 + $0xe4] sm:$0xf0]  ;;  %v2313_v54 = vld [vmem:[#allocation10 + $0x64] sm:$0xf]  ;;  %v2307_v28 = vld [vmem:[#allocation10 + $0x34] sm:$0xf] }
  0x83   : > { %v933_v5 = vunpack.c.l.b16 %v866_v60  ;;  %v934_v6 = vunpack.c.h.b16 %v866_v60  ;;  %v872_v8 = vpack.c.bf16 %v870_v61, %v869_v55  ;;  %1087 = vmatpush.bf16.msra.mxu0 %v925_v2  ;;  %v876_v9 = vmul.f32 %v2904_v38, %v2964_v52  ;;  %v2219_v55 = vld [vmem:[#allocation10 + $0x68] sm:$0xf0]  ;;  %v2329_v56 = vld [vmem:[#allocation10 + $0xe4] sm:$0xf]  ;;  %v2209_v60 = vld [vmem:[#allocation10 + $0x50] sm:$0xf] }
  0x84   : > { %1101 = vmatpush.bf16.msra.mxu1 %v926_v3  ;;  %v877_v10 = vpack.c.bf16 %v874_v62, %v873_v51  ;;  %v941_v13 = vunpack.c.l.b16 %v871_v7  ;;  %v942_v15 = vunpack.c.h.b16 %v871_v7  ;;  %v2992_v44 = vor.u32 %v2332_v30, %v2289_v29  ;;  %v2312_v61 = vld [vmem:[#allocation10 + $0x54] sm:$0xf0]  ;;  %v2273_v62 = vld [vmem:[#allocation10 + $0xd0] sm:$0xf]  ;;  %v2311_v2 = vld [vmem:[#allocation10 + $0x54] sm:$0xf] }
  0x85   : > { %v935_v11 = vpack.c.b16 %v933_v5, %v931_v0  ;;  %v936_v12 = vpack.c.b16 %v934_v6, %v932_v1  ;;  %v943_v14 = vunpack.c.l.b16 %v872_v8  ;;  %v944_v16 = vunpack.c.h.b16 %v872_v8  ;;  %v2211_v3 = vld [vmem:[#allocation10 + $0x58] sm:$0xf0]  ;;  %v2327_v5 = vld [vmem:[#allocation10 + $0xd4] sm:$0xf] }
  0x86   : > { %v878_v17 = vpack.c.bf16 %v876_v9, %v875_v63  ;;  %v951_v18 = vunpack.c.l.b16 %v877_v10  ;;  %v952_v20 = vunpack.c.h.b16 %v877_v10  ;;  %v2994_v51 = vor.u32 %v2315_v33, %v2227_v34  ;;  %v2328_v63 = vld [vmem:[#allocation10 + $0xd4] sm:$0xf0]  ;;  %v2275_v6 = vld [vmem:[#allocation10 + $0xd8] sm:$0xf0]  ;;  %v2201_v9 = vld [vmem:[#allocation10 + $0x40] sm:$0xf] }
  0x87   : > { %1115 = vmatpush.bf16.msra.mxu2 %v935_v11  ;;  %1129 = vmatpush.bf16.msra.mxu3 %v936_v12  ;;  %v945_v19 = vpack.c.b16 %v943_v14, %v941_v13  ;;  %v946_v21 = vpack.c.b16 %v944_v16, %v942_v15  ;;  %v2996_v53 = vor.u32 %v2331_v35, %v2291_v39  ;;  %v2310_v10 = vld [vmem:[#allocation10 + $0x44] sm:$0xf0]  ;;  %v2265_v11 = vld [vmem:[#allocation10 + $0xc0] sm:$0xf]  ;;  %v2309_v15 = vld [vmem:[#allocation10 + $0x44] sm:$0xf] }
  0x88   : > { %v953_v22 = vunpack.c.l.b16 %v878_v17  ;;  %v954_v23 = vunpack.c.h.b16 %v878_v17  ;;  %v3004_v58 = vor.u32 %v2314_v47, %v2217_v45  ;;  %v3006_v59 = vor.u32 %v2330_v50, %v2281_v49  ;;  %v2326_v12 = vld [vmem:[#allocation10 + $0xc4] sm:$0xf0]  ;;  %v2203_v16 = vld [vmem:[#allocation10 + $0x48] sm:$0xf0]  ;;  %v2325_v17 = vld [vmem:[#allocation10 + $0xc4] sm:$0xf] }
  0x89   : > { %2155 = vmatmul.msk.bf16.vlgmr.msrb.gmra.mxu0 %vm964_vm0, %v2934_v4  ;;  %2156 = vmatmul.msk.bf16.vlgmr.msrb.gmra.mxu1 %vm964_vm0, %v2934_v4  ;;  %v3014_v0 = vor.u32 %v2313_v54, %v2219_v55  ;;  %v3016_v1 = vor.u32 %v2329_v56, %v2283_v57  ;;  %v3020_v7 = vor.u32 %v2312_v61, %v2209_v60  ;;  %v2195_v29 = vld [vmem:[#allocation10 + $0x38] sm:$0xf0]  ;;  %v2323_v30 = vld [vmem:[#allocation10 + $0xb4] sm:$0xf]  ;;  %v2185_v39 = vld [vmem:[#allocation10 + $0x20] sm:$0xf] }
  0x8a   : > { %1143 = vmatpush.bf16.msrb.mxu0 %v945_v19  ;;  %1157 = vmatpush.bf16.msrb.mxu1 %v946_v21  ;;  %v955_v24 = vpack.c.b16 %v953_v22, %v951_v18  ;;  %v956_v26 = vpack.c.b16 %v954_v23, %v952_v20  ;;  %v3022_v8 = vor.u32 %v2328_v63, %v2273_v62  ;;  %v2267_v18 = vld [vmem:[#allocation10 + $0xc8] sm:$0xf0]  ;;  %v2193_v21 = vld [vmem:[#allocation10 + $0x30] sm:$0xf]  ;;  %v2308_v22 = vld [vmem:[#allocation10 + $0x34] sm:$0xf0] }
  0x8b   : > { %2157 = vmatmul.msk.bf16.vlgmr.msrb.gmra.mxu2 %vm964_vm0, %v2934_v4  ;;  %2158 = vmatmul.msk.bf16.vlgmr.msrb.gmra.mxu3 %vm964_vm0, %v2934_v4  ;;  %v3026_v13 = vor.u32 %v2311_v2, %v2211_v3  ;;  %v3028_v14 = vor.u32 %v2327_v5, %v2275_v6  ;;  %v3032_v19 = vor.u32 %v2310_v10, %v2201_v9  ;;  %v2257_v23 = vld [vmem:[#allocation10 + $0xb0] sm:$0xf]  ;;  %v2259_v33 = vld [vmem:[#allocation10 + $0xb8] sm:$0xf0]  ;;  %v2306_v45 = vld [vmem:[#allocation10 + $0x24] sm:$0xf0] }
  0x8c   : > { %1171 = vmatpush.bf16.msrb.mxu2 %v955_v24  ;;  %1185 = vmatpush.bf16.msrb.mxu3 %v956_v26  ;;  %v3034_v20 = vor.u32 %v2326_v12, %v2265_v11  ;;  %v2324_v24 = vld [vmem:[#allocation10 + $0xb4] sm:$0xf0]  ;;  %v3038_v26 = vor.u32 %v2309_v15, %v2203_v16  ;;  %v3040_v27 = vor.u32 %v2325_v17, %v2267_v18  ;;  %v2249_v47 = vld [vmem:[#allocation10 + $0xa0] sm:$0xf]  ;;  %v2322_v49 = vld [vmem:[#allocation10 + $0xa4] sm:$0xf0] }
  0x8d   : > { %v3044_v34 = vor.u32 %v2308_v22, %v2193_v21  ;;  %v3046_v35 = vor.u32 %v2324_v24, %v2257_v23  ;;  %v3050_v50 = vor.u32 %v2307_v28, %v2195_v29  ;;  %v3052_v54 = vor.u32 %v2323_v30, %v2259_v33  ;;  %v2305_v55 = vld [vmem:[#allocation10 + $0x24] sm:$0xf]  ;;  %v2187_v56 = vld [vmem:[#allocation10 + $0x28] sm:$0xf0]  ;;  %v2177_v63 = vld [vmem:[#allocation10 + $0x10] sm:$0xf] }
  0x8e   : > { %v2321_v57 = vld [vmem:[#allocation10 + $0xa4] sm:$0xf]  ;;  %v2251_v60 = vld [vmem:[#allocation10 + $0xa8] sm:$0xf0]  ;;  %v3060_v61 = vor.u32 %v2306_v45, %v2185_v39  ;;  %v3062_v62 = vor.u32 %v2322_v49, %v2249_v47  ;;  %v2304_v2 = vld [vmem:[#allocation10 + $0x14] sm:$0xf0]  ;;  %v3070_v6 = vor.u32 %v2305_v55, %v2187_v56 }
  0x8f   : > { %v2241_v3 = vld [vmem:[#allocation10 + $0x90] sm:$0xf]  ;;  %v2320_v5 = vld [vmem:[#allocation10 + $0x94] sm:$0xf0]  ;;  %v3072_v9 = vor.u32 %v2321_v57, %v2251_v60  ;;  %v2303_v10 = vld [vmem:[#allocation10 + $0x14] sm:$0xf] }
  0x90   : > { %v2179_v11 = vld [vmem:[#allocation10 + $0x18] sm:$0xf0]  ;;  %v2319_v12 = vld [vmem:[#allocation10 + $0x94] sm:$0xf]  ;;  %v3078_v16 = vor.u32 %v2320_v5, %v2241_v3  ;;  %v2169_v17 = vld [vmem:[#allocation10] sm:$0xf] }
  0x91   : > { %v2243_v15 = vld [vmem:[#allocation10 + $0x98] sm:$0xf0]  ;;  %v2302_v18 = vld [vmem:[#allocation10 + $0x4] sm:$0xf0]  ;;  %v2233_v21 = vld [vmem:[#allocation10 + $0x80] sm:$0xf]  ;;  %v3082_v23 = vor.u32 %v2303_v10, %v2179_v11  ;;  %v3998_v10 = vlaneseq }
  0x92   : > { %v2318_v22 = vld [vmem:[#allocation10 + $0x84] sm:$0xf0]  ;;  %v3084_v24 = vor.u32 %v2319_v12, %v2243_v15  ;;  %v2301_v28 = vld [vmem:[#allocation10 + $0x4] sm:$0xf]  ;;  %v2171_v29 = vld [vmem:[#allocation10 + $0x8] sm:$0xf0]  ;;  %v3088_v39 = vor.u32 %v2302_v18, %v2169_v17 }
  0x93   : > { %v2317_v30 = vld [vmem:[#allocation10 + $0x84] sm:$0xf]  ;;  %v2235_v33 = vld [vmem:[#allocation10 + $0x88] sm:$0xf0]  ;;  %v3090_v45 = vor.u32 %v2318_v22, %v2233_v21  ;;  %v3094_v47 = vor.u32 %v2301_v28, %v2171_v29  ;;  %v3135_v11 = vshrl.u32 %v3998_v10, 7  ;;  %v4001_v12 = vrot.slane %v2950_v40, 7 }
  0x94   : > { %v3096_v49 = vor.u32 %v2317_v30, %v2235_v33  ;;  %v4002_v15 = vrot.slane %v2956_v46, 7  ;;  %v4000_v17 = vrot.slane %v2950_v40, 1  ;;  %v3999_v18 = vrot.slane %v2956_v46, 1 }
  0x95   : > { %vm379_vm1 = vcmp.eq.s32.totalorder %v3135_v11, 0  ;;  %vm383_vm2 = vcmp.eq.s32.totalorder %v3135_v11, 7  ;;  %vm517_vm3 = vcmp.lt.s32.totalorder %v3135_v11, 1  ;;  %v3996_v21 = vmov 1.0  }
  0x96   : > { %v3149_v22 = vsel %vm379_vm1, 0.0, %v3996_v21  ;;  %v3152_v28 = vsel %vm383_vm2, 0.0, %v3996_v21  ;;  %vm530_vm4 = vcmp.lt.s32.totalorder %v3135_v11, 7  ;;  %v655_v29 = vsel %vm517_vm3, %v4002_v15, %v4001_v12 }
  0x97   : > { %v665_v30 = vsel %vm530_vm4, %v4000_v17, %v3999_v18  ;;  %v4003_v33 = vrot.slane %v2900_v36, 7  ;;  %v4019_v15 = vrot.slane %v2912_v42, 7  ;;  %v4018_v38 = vrot.slane %v2964_v52, 7 }
  0x98   : > { %v4017_v32 = vrot.slane %v2958_v48, 1  ;;  %v4016_v31 = vrot.slane %v2964_v52, 1  ;;  %v675_v11 = vmul.f32 2.0, %v2956_v46 }
  0x99   : > { %2159 = vmatmul.msk.bf16.vlgmr.msra.gmra.mxu0 %vm964_vm0, %v2934_v4  ;;  %2160 = vmatmul.msk.bf16.vlgmr.msra.gmra.mxu1 %vm964_vm0, %v2934_v4 }
  0x9a   : > { %1354 = vmatpush.bf16.msra.mxu0 %v2990_v41  ;;  %1368 = vmatpush.bf16.msra.mxu1 %v2992_v44 }
  0x9b   : > { %2161 = vmatmul.msk.bf16.vlgmr.msra.gmra.mxu2 %vm964_vm0, %v2934_v4  ;;  %2162 = vmatmul.msk.bf16.vlgmr.msra.gmra.mxu3 %vm964_vm0, %v2934_v4 }
  0x9c   : > { %1382 = vmatpush.bf16.msra.mxu2 %v2994_v51  ;;  %1396 = vmatpush.bf16.msra.mxu3 %v2996_v53 }
  0x9e   : > { %1355 = vmatpush.bf16.msra.mxu0 %v3004_v58  ;;  %1369 = vmatpush.bf16.msra.mxu1 %v3006_v59 }
  0xa0   : > { %1383 = vmatpush.bf16.msra.mxu2 %v3014_v0  ;;  %1397 = vmatpush.bf16.msra.mxu3 %v3016_v1 }
  0xa2   : > { %1356 = vmatpush.bf16.msra.mxu0 %v3020_v7  ;;  %1370 = vmatpush.bf16.msra.mxu1 %v3022_v8 }
  0xa4   : > { %1384 = vmatpush.bf16.msra.mxu2 %v3026_v13  ;;  %1398 = vmatpush.bf16.msra.mxu3 %v3028_v14 }
  0xa6   : > { %1357 = vmatpush.bf16.msra.mxu0 %v3032_v19  ;;  %1371 = vmatpush.bf16.msra.mxu1 %v3034_v20 }
  0xa8   : > { %1385 = vmatpush.bf16.msra.mxu2 %v3038_v26  ;;  %1399 = vmatpush.bf16.msra.mxu3 %v3040_v27 }
  0xa9   : > { %2163 = vmatmul.msk.bf16.vlgmr.msrb.gmra.mxu0 %vm964_vm0, %v2934_v4  ;;  %2164 = vmatmul.msk.bf16.vlgmr.msrb.gmra.mxu1 %vm964_vm0, %v2934_v4 }
  0xaa   : > { %1358 = vmatpush.bf16.msra.mxu0 %v3044_v34  ;;  %1372 = vmatpush.bf16.msra.mxu1 %v3046_v35 }
  0xab   : > { %2165 = vmatmul.msk.bf16.vlgmr.msrb.gmra.mxu2 %vm964_vm0, %v2934_v4  ;;  %2166 = vmatmul.msk.bf16.vlgmr.msrb.gmra.mxu3 %vm964_vm0, %v2934_v4  ;;  %v3076_v4 = vor.u32 %v2304_v2, %v2177_v63 }
  0xac   : > { %1386 = vmatpush.bf16.msra.mxu2 %v3050_v50  ;;  %1400 = vmatpush.bf16.msra.mxu3 %v3052_v54 }
  0xae   : > { %1359 = vmatpush.bf16.msra.mxu0 %v3060_v61  ;;  %1373 = vmatpush.bf16.msra.mxu1 %v3062_v62 }
  0xb0   : > { %1387 = vmatpush.bf16.msra.mxu2 %v3070_v6  ;;  %1401 = vmatpush.bf16.msra.mxu3 %v3072_v9 }
  0xb2   : > { %1360 = vmatpush.bf16.msra.mxu0 %v3076_v4  ;;  %1374 = vmatpush.bf16.msra.mxu1 %v3078_v16 }
  0xb4   : > { %1388 = vmatpush.bf16.msra.mxu2 %v3082_v23  ;;  %1402 = vmatpush.bf16.msra.mxu3 %v3084_v24 }
  0xb6   : > { %1361 = vmatpush.bf16.msra.mxu0 %v3088_v39  ;;  %1375 = vmatpush.bf16.msra.mxu1 %v3090_v45 }
  0xb8   : > { %1389 = vmatpush.bf16.msra.mxu2 %v3094_v47  ;;  %1403 = vmatpush.bf16.msra.mxu3 %v3096_v49 }
  0xba   : > { %1412 = vmatpush.bf16.msrb.mxu0 %v2990_v41  ;;  %1426 = vmatpush.bf16.msrb.mxu1 %v2992_v44 }
  0xbc   : > { %1440 = vmatpush.bf16.msrb.mxu2 %v2994_v51  ;;  %1454 = vmatpush.bf16.msrb.mxu3 %v2996_v53 }
  0xbe   : > { %1413 = vmatpush.bf16.msrb.mxu0 %v3004_v58  ;;  %1427 = vmatpush.bf16.msrb.mxu1 %v3006_v59 }
  0xc0   : > { %1441 = vmatpush.bf16.msrb.mxu2 %v3014_v0  ;;  %1455 = vmatpush.bf16.msrb.mxu3 %v3016_v1 }
  0xc2   : > { %1414 = vmatpush.bf16.msrb.mxu0 %v3020_v7  ;;  %1428 = vmatpush.bf16.msrb.mxu1 %v3022_v8 }
  0xc4   : > { %1442 = vmatpush.bf16.msrb.mxu2 %v3026_v13  ;;  %1456 = vmatpush.bf16.msrb.mxu3 %v3028_v14 }
  0xc6   : > { %1415 = vmatpush.bf16.msrb.mxu0 %v3032_v19  ;;  %1429 = vmatpush.bf16.msrb.mxu1 %v3034_v20 }
  0xc8   : > { %1443 = vmatpush.bf16.msrb.mxu2 %v3038_v26  ;;  %1457 = vmatpush.bf16.msrb.mxu3 %v3040_v27 }
  0xca   : > { %1416 = vmatpush.bf16.msrb.mxu0 %v3044_v34  ;;  %1430 = vmatpush.bf16.msrb.mxu1 %v3046_v35 }
  0xcc   : > { %1444 = vmatpush.bf16.msrb.mxu2 %v3050_v50  ;;  %1458 = vmatpush.bf16.msrb.mxu3 %v3052_v54 }
  0xce   : > { %1417 = vmatpush.bf16.msrb.mxu0 %v3060_v61  ;;  %1431 = vmatpush.bf16.msrb.mxu1 %v3062_v62 }
  0xd0   : > { %1445 = vmatpush.bf16.msrb.mxu2 %v3070_v6  ;;  %1459 = vmatpush.bf16.msrb.mxu3 %v3072_v9 }
  0xd2   : > { %1418 = vmatpush.bf16.msrb.mxu0 %v3076_v4  ;;  %1432 = vmatpush.bf16.msrb.mxu1 %v3078_v16 }
  0xd4   : > { %1446 = vmatpush.bf16.msrb.mxu2 %v3082_v23  ;;  %1460 = vmatpush.bf16.msrb.mxu3 %v3084_v24 }
  0xd6   : > { %1419 = vmatpush.bf16.msrb.mxu0 %v3088_v39  ;;  %1433 = vmatpush.bf16.msrb.mxu1 %v3090_v45 }
  0xd8   : > { %1447 = vmatpush.bf16.msrb.mxu2 %v3094_v47  ;;  %1461 = vmatpush.bf16.msrb.mxu3 %v3096_v49 }
  0xf6   : > { %v977_v55 = vpop.f32.mrf.mxu0  ;;  %v991_v56 = vpop.f32.mrf.mxu1 }
  0xfe   : > { %v979_v57 = vpop.f32.mrf.mxu0  ;;  %v993_v60 = vpop.f32.mrf.mxu1 }
  0xff   : > { %v1192_v63 = vpack.c.bf16 %v979_v57, %v977_v55  ;;  %v1193_v2 = vpack.c.bf16 %v993_v60, %v991_v56  ;;  %v1005_v3 = vpop.f32.mrf.mxu2  ;;  %v1019_v5 = vpop.f32.mrf.mxu3  ;;  %v4004_v55 = vrot.slane %v2902_v37, 7  ;;  %v3170_v56 = vmul.f32 %v655_v29, %v3149_v22 }
 0x100   : > { %v3173_v57 = vmul.f32 %v665_v30, %v3152_v28  ;;  %v4006_v60 = vrot.slane %v2900_v36, 1 }
 0x101   : > { %1362 = vmatmul.bf16.vlgmr.msra.gmra.mxu0 %v1192_v63  ;;  %1376 = vmatmul.bf16.vlgmr.msra.gmra.mxu1 %v1193_v2  ;;  %v520_v29 = vsel %vm517_vm3, %v4004_v55, %v4003_v33  ;;  %v4020_v55 = vrot.slane %v2914_v43, 7 }
 0x102   : > { %1390 = vmatmul.bf16.vlgmr.msra.gmra.mxu2 %v1192_v63  ;;  %1404 = vmatmul.bf16.vlgmr.msra.gmra.mxu3 %v1193_v2  ;;  %v4005_v63 = vrot.slane %v2902_v37, 1  ;;  %v3189_v30 = vsub.f32 %v3170_v56, %v3173_v57  ;;  %v522_v12 = vmul.f32 %v520_v29, %v3149_v22  ;;  %v4015_v29 = vrot.slane %v2958_v48, 7 }
 0x103   : > { %1470 = vmatpush.bf16.msra.mxu0 %v2990_v41  ;;  %1484 = vmatpush.bf16.msra.mxu1 %v2992_v44 }
 0x104   : > { %1498 = vmatpush.bf16.msra.mxu2 %v2994_v51  ;;  %1512 = vmatpush.bf16.msra.mxu3 %v2996_v53  ;;  %4071 = vst [vmem:[#allocation32_spill] sm:$0xff] %v3189_v30  ;;  %v531_v10 = vsel %vm530_vm4, %v4006_v60, %v4005_v63  ;;  %v4014_v63 = vrot.slane %v2912_v42, 1  ;;  %v4013_v60 = vrot.slane %v2914_v43, 1 }
 0x105   : > { %725 = vrot.lane.b32.xlu1 %v3189_v30, %s2677_s24  ;;  %v3206_v33 = vmul.f32 %v531_v10, %v3152_v28  ;;  %v521_v10 = vsel %vm517_vm3, %v4020_v55, %v4019_v15 }
 0x107   : > { %1471 = vmatpush.bf16.msra.mxu0 %v3004_v58  ;;  %1485 = vmatpush.bf16.msra.mxu1 %v3006_v59  ;;  %v1007_v2 = vpop.f32.mrf.mxu2  ;;  %v1021_v21 = vpop.f32.mrf.mxu3 }
 0x108   : > { %1499 = vmatpush.bf16.msra.mxu2 %v3014_v0  ;;  %1513 = vmatpush.bf16.msra.mxu3 %v3016_v1  ;;  %v1410_v18 = vpack.c.bf16 %v1007_v2, %v1005_v3  ;;  %v1411_v17 = vpack.c.bf16 %v1021_v21, %v1019_v5  ;;  %v1033_v3 = vpop.f32.mrf.mxu0  ;;  %v3216_v5 = vsub.f32 %v522_v12, %v3206_v33  ;;  %v1047_v2 = vpop.f32.mrf.mxu1 }
 0x109   : > { %v532_v21 = vsel %vm530_vm4, %v4014_v63, %v4013_v60  ;;  %v666_v60 = vsel %vm530_vm4, %v4017_v32, %v4016_v31 }
 0x10a   : > { %4072 = vst [vmem:[#allocation33_spill] sm:$0xff] %v3216_v5  ;;  %593 = vrot.lane.b32.xlu0 %v3216_v5, %s2677_s24 }
 0x10b   : > { %1472 = vmatpush.bf16.msra.mxu0 %v3020_v7  ;;  %1486 = vmatpush.bf16.msra.mxu1 %v3022_v8 }
 0x10c   : > { %1500 = vmatpush.bf16.msra.mxu2 %v3026_v13  ;;  %1514 = vmatpush.bf16.msra.mxu3 %v3028_v14 }
 0x10d   : > { %617 = vrot.lane.b32.xlu1 %v3216_v5, %s2678_s11 }
 0x10f   : > { %1473 = vmatpush.bf16.msra.mxu0 %v3032_v19  ;;  %1487 = vmatpush.bf16.msra.mxu1 %v3034_v20 }
 0x110   : > { %1501 = vmatpush.bf16.msra.mxu2 %v3038_v26  ;;  %1515 = vmatpush.bf16.msra.mxu3 %v3040_v27 }
 0x111   : > { %1420 = vmatmul.bf16.vlgmr.msrb.gmra.mxu0 %v1410_v18  ;;  %1434 = vmatmul.bf16.vlgmr.msrb.gmra.mxu1 %v1411_v17 }
 0x112   : > { %1448 = vmatmul.bf16.vlgmr.msrb.gmra.mxu2 %v1410_v18  ;;  %1462 = vmatmul.bf16.vlgmr.msrb.gmra.mxu3 %v1411_v17  ;;  %v523_v18 = vmul.f32 %v521_v10, %v3149_v22  ;;  %v656_v17 = vsel %vm517_vm3, %v4018_v38, %v4015_v29  ;;  %v536_v10 = vmul.f32 %v532_v21, %v3152_v28  ;;  %v1035_v21 = vpop.f32.mrf.mxu0  ;;  %v540_v38 = vmul.f32 2.0, %v2912_v42 }
 0x113   : > { %1474 = vmatpush.bf16.msra.mxu0 %v3044_v34  ;;  %1488 = vmatpush.bf16.msra.mxu1 %v3046_v35  ;;  %v658_v63 = vmul.f32 %v656_v17, %v3149_v22  ;;  %v670_v29 = vmul.f32 %v666_v60, %v3152_v28  ;;  %v539_v17 = vmul.f32 2.0, %v2900_v36  ;;  %v1049_v60 = vpop.f32.mrf.mxu1  ;;  %v1468_v15 = vpack.c.bf16 %v1035_v21, %v1033_v3 }
 0x114   : > { %1502 = vmatpush.bf16.msra.mxu2 %v3050_v50  ;;  %1516 = vmatpush.bf16.msra.mxu3 %v3052_v54  ;;  %v3262_v31 = vsub.f32 %v523_v18, %v536_v10  ;;  %v1469_v55 = vpack.c.bf16 %v1049_v60, %v1047_v2  ;;  %v544_v5 = vadd.f32 %v540_v38, %v523_v18  ;;  %v4074_v38 = vrot.slane %v2914_v43, 7 }
 0x115   : > { %v3264_v32 = vsub.f32 %v658_v63, %v670_v29  ;;  %v543_v25 = vadd.f32 %v539_v17, %v522_v12  ;;  %v4075_v12 = vrot.slane %v2912_v42, 7  ;;  %v4076_v18 = vrot.slane %v2912_v42, 1 }
 0x116   : > { %597 = vrot.lane.b32.xlu0 %v3262_v31, %s2677_s24  ;;  %v3285_v21 = vadd.f32 %v544_v5, %v536_v10  ;;  %v4077_v17 = vrot.slane %v2914_v43, 1  ;;  %v4079_v5 = vrot.slane %v2900_v36, 7  ;;  %v4081_v10 = vrot.slane %v2902_v37, 1 }
 0x117   : > { %1475 = vmatpush.bf16.msra.mxu0 %v3060_v61  ;;  %1489 = vmatpush.bf16.msra.mxu1 %v3062_v62  ;;  %4073 = vst [vmem:[#allocation34_spill] sm:$0xff] %v3264_v32  ;;  %v547_v3 = vadd.f32 %v543_v25, %v3206_v33  ;;  %v519_v2 = vsel %vm517_vm3, %v4075_v12, %v4074_v38  ;;  %v674_v25 = vmul.f32 2.0, %v2958_v48  ;;  %v4078_v33 = vrot.slane %v2902_v37, 7 }
 0x118   : > { %1503 = vmatpush.bf16.msra.mxu2 %v3070_v6  ;;  %1517 = vmatpush.bf16.msra.mxu3 %v3072_v9  ;;  %v534_v60 = vsel %vm530_vm4, %v4077_v17, %v4076_v18  ;;  %v3317_v12 = vmul.f32 %v519_v2, %v3149_v22  ;;  %v4087_v42 = vrot.slane %v2956_v46, 1 }
 0x119   : > { %729 = vrot.lane.b32.xlu1 %v3264_v32, %s2677_s24  ;;  %v3326_v17 = vmul.f32 %v534_v60, %v3152_v28 }
 0x11b   : > { %1476 = vmatpush.bf16.msra.mxu0 %v3076_v4  ;;  %1490 = vmatpush.bf16.msra.mxu1 %v3078_v16  ;;  %v3341_v60 = vsub.f32 %v3317_v12, %v3326_v17 }
 0x11c   : > { %1504 = vmatpush.bf16.msra.mxu2 %v3082_v23  ;;  %1518 = vmatpush.bf16.msra.mxu3 %v3084_v24 }
 0x11d   : > { %4083 = vst [vmem:[#allocation36_spill] sm:$0xff] %v3341_v60 }
 0x11e   : > { %572 = vrot.lane.b32.xlu0 %v547_v3, %s2677_s24 }
 0x11f   : > { %1477 = vmatpush.bf16.msra.mxu0 %v3088_v39  ;;  %1491 = vmatpush.bf16.msra.mxu1 %v3090_v45 }
 0x120   : > { %1505 = vmatpush.bf16.msra.mxu2 %v3094_v47  ;;  %1519 = vmatpush.bf16.msra.mxu3 %v3096_v49 }
 0x121   : > { %576 = vrot.lane.b32.xlu1 %v3285_v21, %s2677_s24 }
 0x122   : > { %1478 = vmatmul.bf16.vlgmr.msra.gmra.mxu0 %v1468_v15  ;;  %1492 = vmatmul.bf16.vlgmr.msra.gmra.mxu1 %v1469_v55 }
 0x123   : > { %1528 = vmatpush.bf16.msrb.mxu0 %v2990_v41  ;;  %1542 = vmatpush.bf16.msrb.mxu1 %v2992_v44 }
 0x124   : > { %1556 = vmatpush.bf16.msrb.mxu2 %v2994_v51  ;;  %1570 = vmatpush.bf16.msrb.mxu3 %v2996_v53 }
 0x125   : > { %1506 = vmatmul.bf16.vlgmr.msra.gmra.mxu2 %v1468_v15  ;;  %1520 = vmatmul.bf16.vlgmr.msra.gmra.mxu3 %v1469_v55  ;;  %v518_v15 = vsel %vm517_vm3, %v4079_v5, %v4078_v33  ;;  %v4080_v55 = vrot.slane %v2900_v36, 1  ;;  %v678_v33 = vadd.f32 %v674_v25, %v658_v63  ;;  %v673_v25 = vmul.f32 2.0, %v2950_v40  ;;  %v1075_v36 = vpop.f32.mrf.mxu3 }
 0x126   : > { %v3320_v18 = vmul.f32 %v518_v15, %v3149_v22  ;;  %v4084_v15 = vrot.slane %v2956_v46, 7  ;;  %599 = vrot.lane.b32.xlu0 %v3341_v60, %s2677_s24 }
 0x127   : > { %1529 = vmatpush.bf16.msrb.mxu0 %v3004_v58  ;;  %1543 = vmatpush.bf16.msrb.mxu1 %v3006_v59  ;;  %v533_v38 = vsel %vm530_vm4, %v4081_v10, %v4080_v55  ;;  %v682_v63 = vadd.f32 %v678_v33, %v670_v29  ;;  %v4085_v55 = vrot.slane %v2950_v40, 7  ;;  %v677_v29 = vadd.f32 %v673_v25, %v3170_v56 }
 0x128   : > { %1557 = vmatpush.bf16.msrb.mxu2 %v3014_v0  ;;  %1571 = vmatpush.bf16.msrb.mxu3 %v3016_v1  ;;  %v3329_v5 = vmul.f32 %v533_v38, %v3152_v28  ;;  %v4086_v33 = vrot.slane %v2950_v40, 1 }
 0x129   : > { %v653_v10 = vsel %vm517_vm3, %v4085_v55, %v4084_v15  ;;  %693 = vrot.lane.b32.xlu1 %v682_v63, %s2678_s11  ;;  %v1061_v55 = vpop.f32.mrf.mxu2  ;;  %v681_v56 = vadd.f32 %v677_v29, %v3173_v57 }
 0x12a   : > { %v3335_v2 = vsub.f32 %v3320_v18, %v3329_v5  ;;  %v3361_v38 = vmul.f32 %v653_v10, %v3149_v22  ;;  %v667_v15 = vsel %vm530_vm4, %v4087_v42, %v4086_v33  ;;  %v542_v33 = vmul.f32 2.0, %v2914_v43 }
 0x12b   : > { %1530 = vmatpush.bf16.msrb.mxu0 %v3020_v7  ;;  %1544 = vmatpush.bf16.msrb.mxu1 %v3022_v8 }
 0x12c   : > { %4082 = vst [vmem:[#allocation35_spill] sm:$0xff] %v3335_v2  ;;  %1558 = vmatpush.bf16.msrb.mxu2 %v3026_v13  ;;  %1572 = vmatpush.bf16.msrb.mxu3 %v3028_v14 }
 0x12d   : > { %595 = vrot.lane.b32.xlu2 %v3335_v2, %s2677_s24  ;;  %v3370_v2 = vmul.f32 %v667_v15, %v3152_v28  ;;  %v1077_v57 = vpop.f32.mrf.mxu3  ;;  %v4090_v15 = vrot.slane %v2958_v48, 7 }
 0x12e   : > { %689 = vrot.lane.b32.xlu0 %v681_v56, %s2678_s11  ;;  %v1527_v10 = vpack.c.bf16 %v1077_v57, %v1075_v36  ;;  %v541_v36 = vmul.f32 2.0, %v2902_v37 }
 0x12f   : > { %1531 = vmatpush.bf16.msrb.mxu0 %v3032_v19  ;;  %1545 = vmatpush.bf16.msrb.mxu1 %v3034_v20  ;;  %v3379_v25 = vsub.f32 %v3361_v38, %v3370_v2 }
 0x130   : > { %1559 = vmatpush.bf16.msrb.mxu2 %v3038_v26  ;;  %1573 = vmatpush.bf16.msrb.mxu3 %v3040_v27  ;;  %v545_v29 = vadd.f32 %v541_v36, %v3320_v18  ;;  %v4089_v18 = vrot.slane %v2964_v52, 7 }
 0x131   : > { %4088 = vst [vmem:[#allocation37_spill] sm:$0xff] %v3379_v25  ;;  %727 = vrot.lane.b32.xlu1 %v3379_v25, %s2677_s24  ;;  %v1063_v42 = vpop.f32.mrf.mxu2 }
 0x133   : > { %1532 = vmatpush.bf16.msrb.mxu0 %v3044_v34  ;;  %1546 = vmatpush.bf16.msrb.mxu1 %v3046_v35 }
 0x134   : > { %1560 = vmatpush.bf16.msrb.mxu2 %v3050_v50  ;;  %1574 = vmatpush.bf16.msrb.mxu3 %v3052_v54 }
 0x135   : > { %555 = vrot.lane.b32.xlu2 %v547_v3, %s2678_s11  ;;  %v1526_v3 = vpack.c.bf16 %v1063_v42, %v1061_v55  ;;  %v4091_v55 = vrot.slane %v2958_v48, 1  ;;  %v4092_v42 = vrot.slane %v2964_v52, 1 }
 0x136   : > { %709 = vrot.lane.b32.xlu0 %v682_v63, %s2677_s24  ;;  %v549_v63 = vadd.f32 %v545_v29, %v3329_v5  ;;  %v654_v5 = vsel %vm517_vm3, %v4090_v15, %v4089_v18  ;;  %v676_v18 = vmul.f32 2.0, %v2964_v52 }
 0x137   : > { %1533 = vmatpush.bf16.msrb.mxu0 %v3060_v61  ;;  %1547 = vmatpush.bf16.msrb.mxu1 %v3062_v62  ;;  %v668_v57 = vsel %vm530_vm4, %v4092_v42, %v4091_v55  ;;  %v4094_v55 = vld [vmem:[#allocation35_spill] sm:$0xff] }
 0x138   : > { %1561 = vmatpush.bf16.msrb.mxu2 %v3070_v6  ;;  %1575 = vmatpush.bf16.msrb.mxu3 %v3072_v9 }
 0x139   : > { %753 = vrot.lane.b32.xlu1 %v3264_v32, %s2678_s11  ;;  %v1117_v15 = vpop.f32.mrf.mxu2 }
 0x13b   : > { %1534 = vmatpush.bf16.msrb.mxu0 %v3076_v4  ;;  %1548 = vmatpush.bf16.msrb.mxu1 %v3078_v16 }
 0x13c   : > { %1562 = vmatpush.bf16.msrb.mxu2 %v3082_v23  ;;  %1576 = vmatpush.bf16.msrb.mxu3 %v3084_v24 }
 0x13d   : > { %621 = vrot.lane.b32.xlu2 %v3262_v31, %s2678_s11 }
 0x13e   : > { %749 = vrot.lane.b32.xlu0 %v3189_v30, %s2678_s11 }
 0x13f   : > { %1535 = vmatpush.bf16.msrb.mxu0 %v3088_v39  ;;  %1549 = vmatpush.bf16.msrb.mxu1 %v3090_v45 }
 0x140   : > { %1563 = vmatpush.bf16.msrb.mxu2 %v3094_v47  ;;  %1577 = vmatpush.bf16.msrb.mxu3 %v3096_v49 }
 0x141   : > { %574 = vrot.lane.b32.xlu1 %v549_v63, %s2677_s24 }
 0x142   : > { %1536 = vmatmul.bf16.vlgmr.msrb.gmra.mxu0 %v1526_v3  ;;  %1550 = vmatmul.bf16.vlgmr.msrb.gmra.mxu1 %v1527_v10 }
 0x143   : > { %1586 = vmatpush.bf16.msra.mxu0 %v2990_v41  ;;  %1600 = vmatpush.bf16.msra.mxu1 %v2992_v44 }
 0x144   : > { %1614 = vmatpush.bf16.msra.mxu2 %v2994_v51  ;;  %1628 = vmatpush.bf16.msra.mxu3 %v2996_v53 }
 0x145   : > { %1564 = vmatmul.bf16.vlgmr.msrb.gmra.mxu2 %v1526_v3  ;;  %1578 = vmatmul.bf16.vlgmr.msrb.gmra.mxu3 %v1527_v10  ;;  %v1089_v3 = vpop.f32.mrf.mxu0  ;;  %v1103_v10 = vpop.f32.mrf.mxu1 }
 0x146   : > { %559 = vrot.lane.b32.xlu2 %v3285_v21, %s2678_s11  ;;  %v546_v21 = vadd.f32 %v542_v33, %v3317_v12  ;;  %v672_v12 = vmul.f32 %v668_v57, %v3152_v28  ;;  %v1119_v57 = vpop.f32.mrf.mxu2 }
 0x147   : > { %1587 = vmatpush.bf16.msra.mxu0 %v3004_v58  ;;  %1601 = vmatpush.bf16.msra.mxu1 %v3006_v59 }
 0x148   : > { %1615 = vmatpush.bf16.msra.mxu2 %v3014_v0  ;;  %1629 = vmatpush.bf16.msra.mxu3 %v3016_v1  ;;  %v550_v36 = vadd.f32 %v546_v21, %v3326_v17  ;;  %v679_v17 = vadd.f32 %v675_v11, %v3361_v38 }
 0x149   : > { %623 = vrot.lane.b32.xlu1 %v3341_v60, %s2678_s11 }
 0x14a   : > { %561 = vrot.lane.b32.xlu0 %v550_v36, %s2678_s11  ;;  %v683_v38 = vadd.f32 %v679_v17, %v3370_v2 }
 0x14b   : > { %1588 = vmatpush.bf16.msra.mxu0 %v3020_v7  ;;  %1602 = vmatpush.bf16.msra.mxu1 %v3022_v8 }
 0x14c   : > { %1616 = vmatpush.bf16.msra.mxu2 %v3026_v13  ;;  %1630 = vmatpush.bf16.msra.mxu3 %v3028_v14 }
 0x14d   : > { %v1105_v28 = vpop.f32.mrf.mxu1 }
 0x14e   : > { %705 = vrot.lane.b32.xlu2 %v681_v56, %s2677_s24  ;;  %v660_v56 = vmul.f32 %v654_v5, %v3149_v22  ;;  %v1091_v22 = vpop.f32.mrf.mxu0  ;;  %v1585_v21 = vpack.c.bf16 %v1105_v28, %v1103_v10  ;;  %v1131_v5 = vpop.f32.mrf.mxu3 }
 0x14f   : > { %1589 = vmatpush.bf16.msra.mxu0 %v3032_v19  ;;  %1603 = vmatpush.bf16.msra.mxu1 %v3034_v20  ;;  %v1584_v33 = vpack.c.bf16 %v1091_v22, %v1089_v3  ;;  %v1642_v22 = vpack.c.bf16 %v1119_v57, %v1117_v15 }
 0x150   : > { %1617 = vmatpush.bf16.msra.mxu2 %v3038_v26  ;;  %1631 = vmatpush.bf16.msra.mxu3 %v3040_v27  ;;  %v3448_v29 = vsub.f32 %v660_v56, %v672_v12  ;;  %v680_v42 = vadd.f32 %v676_v18, %v660_v56 }
 0x151   : > { %707 = vrot.lane.b32.xlu1 %v683_v38, %s2677_s24 }
 0x152   : > { %4093 = vst [vmem:[#allocation38_spill] sm:$0xff] %v3448_v29  ;;  %619 = vrot.lane.b32.xlu0 %v4094_v55, %s2678_s11  ;;  %v684_v2 = vadd.f32 %v680_v42, %v672_v12  ;;  %v3507_v12 = vpop.f32.mrf.mxu2 }
 0x153   : > { %1590 = vmatpush.bf16.msra.mxu0 %v3044_v34  ;;  %1604 = vmatpush.bf16.msra.mxu1 %v3046_v35 }
 0x154   : > { %1618 = vmatpush.bf16.msra.mxu2 %v3050_v50  ;;  %1632 = vmatpush.bf16.msra.mxu3 %v3052_v54 }
 0x155   : > { %v3496_v10 = vpop.f32.mrf.mxu1 }
 0x156   : > { %731 = vrot.lane.b32.xlu2 %v3448_v29, %s2677_s24  ;;  %v1133_v3 = vpop.f32.mrf.mxu3 }
 0x157   : > { %1591 = vmatpush.bf16.msra.mxu0 %v3060_v61  ;;  %1605 = vmatpush.bf16.msra.mxu1 %v3062_v62  ;;  %v1643_v28 = vpack.c.bf16 %v1133_v3, %v1131_v5 }
 0x158   : > { %1619 = vmatpush.bf16.msra.mxu2 %v3070_v6  ;;  %1633 = vmatpush.bf16.msra.mxu3 %v3072_v9 }
 0x159   : > { %755 = vrot.lane.b32.xlu1 %v3448_v29, %s2678_s11 }
 0x15a   : > { %695 = vrot.lane.b32.xlu0 %v684_v2, %s2678_s11  ;;  %v3530_v17 = vpop.f32.mrf.mxu2 }
 0x15b   : > { %1592 = vmatpush.bf16.msra.mxu0 %v3076_v4  ;;  %1606 = vmatpush.bf16.msra.mxu1 %v3078_v16 }
 0x15c   : > { %1620 = vmatpush.bf16.msra.mxu2 %v3082_v23  ;;  %1634 = vmatpush.bf16.msra.mxu3 %v3084_v24 }
 0x15d   : > { %v3518_v11 = vpop.f32.mrf.mxu1 }
 0x15e   : > { %557 = vrot.lane.b32.xlu2 %v549_v63, %s2678_s11  ;;  %v3494_v63 = vpop.f32.mrf.mxu0  ;;  %v3509_v56 = vpop.f32.mrf.mxu3 }
 0x15f   : > { %1593 = vmatpush.bf16.msra.mxu0 %v3088_v39  ;;  %1607 = vmatpush.bf16.msra.mxu1 %v3090_v45 }
 0x160   : > { %1621 = vmatpush.bf16.msra.mxu2 %v3094_v47  ;;  %1635 = vmatpush.bf16.msra.mxu3 %v3096_v49 }
 0x162   : > { %1594 = vmatmul.bf16.vlgmr.msra.gmra.mxu0 %v1584_v33  ;;  %1608 = vmatmul.bf16.vlgmr.msra.gmra.mxu1 %v1585_v21 }
 0x163   : > { %1644 = vmatpush.bf16.msrb.mxu0 %v2990_v41  ;;  %1658 = vmatpush.bf16.msrb.mxu1 %v2992_v44 }
 0x164   : > { %1672 = vmatpush.bf16.msrb.mxu2 %v2994_v51  ;;  %1686 = vmatpush.bf16.msrb.mxu3 %v2996_v53 }
 0x165   : > { %1622 = vmatmul.bf16.vlgmr.msra.gmra.mxu2 %v1584_v33  ;;  %1636 = vmatmul.bf16.vlgmr.msra.gmra.mxu3 %v1585_v21 }
 0x166   : > { %578 = vrot.lane.b32.xlu2 %v550_v36, %s2677_s24  ;;  %751 = vrot.lane.b32.xlu0 %v3379_v25, %s2678_s11  ;;  %v3516_v36 = vpop.f32.mrf.mxu0  ;;  %v3532_v33 = vpop.f32.mrf.mxu3 }
 0x167   : > { %1645 = vmatpush.bf16.msrb.mxu0 %v3004_v58  ;;  %1659 = vmatpush.bf16.msrb.mxu1 %v3006_v59  ;;  %4095 = vst [vmem:[#allocation39_spill] sm:$0xff] %v3532_v33 }
 0x168   : > { %1673 = vmatpush.bf16.msrb.mxu2 %v3014_v0  ;;  %1687 = vmatpush.bf16.msrb.mxu3 %v3016_v1 }
 0x16b   : > { %1646 = vmatpush.bf16.msrb.mxu0 %v3020_v7  ;;  %1660 = vmatpush.bf16.msrb.mxu1 %v3022_v8 }
 0x16c   : > { %1674 = vmatpush.bf16.msrb.mxu2 %v3026_v13  ;;  %1688 = vmatpush.bf16.msrb.mxu3 %v3028_v14 }
 0x16e   : > { %691 = vrot.lane.b32.xlu2 %v683_v38, %s2678_s11 }
 0x16f   : > { %1647 = vmatpush.bf16.msrb.mxu0 %v3032_v19  ;;  %1661 = vmatpush.bf16.msrb.mxu1 %v3034_v20 }
 0x170   : > { %1675 = vmatpush.bf16.msrb.mxu2 %v3038_v26  ;;  %1689 = vmatpush.bf16.msrb.mxu3 %v3040_v27 }
 0x173   : > { %1648 = vmatpush.bf16.msrb.mxu0 %v3044_v34  ;;  %1662 = vmatpush.bf16.msrb.mxu1 %v3046_v35 }
 0x174   : > { %1676 = vmatpush.bf16.msrb.mxu2 %v3050_v50  ;;  %1690 = vmatpush.bf16.msrb.mxu3 %v3052_v54 }
 0x176   : > { %711 = vrot.lane.b32.xlu2 %v684_v2, %s2677_s24 }
 0x177   : > { %1649 = vmatpush.bf16.msrb.mxu0 %v3060_v61  ;;  %1663 = vmatpush.bf16.msrb.mxu1 %v3062_v62  ;;  %v726_v15 = vpop.permute.xlu1 %725 }
 0x178   : > { %1677 = vmatpush.bf16.msrb.mxu2 %v3070_v6  ;;  %1691 = vmatpush.bf16.msrb.mxu3 %v3072_v9 }
 0x17b   : > { %1650 = vmatpush.bf16.msrb.mxu0 %v3076_v4  ;;  %1664 = vmatpush.bf16.msrb.mxu1 %v3078_v16 }
 0x17c   : > { %1678 = vmatpush.bf16.msrb.mxu2 %v3082_v23  ;;  %1692 = vmatpush.bf16.msrb.mxu3 %v3084_v24 }
 0x17e   : > { %v1363_v21 = vpop.f32.mrf.mxu0  ;;  %v1377_v18 = vpop.f32.mrf.mxu1 }
 0x17f   : > { %1651 = vmatpush.bf16.msrb.mxu0 %v3088_v39  ;;  %1665 = vmatpush.bf16.msrb.mxu1 %v3090_v45  ;;  %v3536_v38 = vadd.f32 %v1377_v18, %v1363_v21  ;;  %v594_v18 = vpop.permute.xlu0 %593  ;;  %v3554_v43 = vpop.permute.xlu1 %617 }
 0x180   : > { %1679 = vmatpush.bf16.msrb.mxu2 %v3094_v47  ;;  %1693 = vmatpush.bf16.msrb.mxu3 %v3096_v49 }
 0x181   : > { %v3575_v29 = vmul.f32 %v3536_v38, %v3536_v38 }
 0x182   : > { %1652 = vmatmul.bf16.vlgmr.msrb.gmra.mxu0 %v1642_v22  ;;  %1666 = vmatmul.bf16.vlgmr.msrb.gmra.mxu1 %v1643_v28 }
 0x183   : > { %1702 = vmatpush.bf16.msra.mxu0 %v2990_v41  ;;  %1716 = vmatpush.bf16.msra.mxu1 %v2992_v44 }
 0x184   : > { %1730 = vmatpush.bf16.msra.mxu2 %v2994_v51  ;;  %1744 = vmatpush.bf16.msra.mxu3 %v2996_v53 }
 0x185   : > { %1680 = vmatmul.bf16.vlgmr.msrb.gmra.mxu2 %v1642_v22  ;;  %1694 = vmatmul.bf16.vlgmr.msrb.gmra.mxu3 %v1643_v28  ;;  %v1391_v5 = vpop.f32.mrf.mxu2  ;;  %v1405_v42 = vpop.f32.mrf.mxu3  ;;  %v4096_v28 = vlaneseq }
 0x186   : > { %v3545_v57 = vadd.f32 %v1405_v42, %v1391_v5  ;;  %v1365_v3 = vpop.f32.mrf.mxu0  ;;  %v1379_v22 = vpop.f32.mrf.mxu1 }
 0x187   : > { %1703 = vmatpush.bf16.msra.mxu0 %v3004_v58  ;;  %1717 = vmatpush.bf16.msra.mxu1 %v3006_v59  ;;  %v3548_v21 = vand.u32 127, %v4096_v28  ;;  %v3552_v2 = vadd.f32 %v1379_v22, %v1365_v3  ;;  %v3558_v5 = vpop.permute.xlu2 %595  ;;  %v4097_v22 = vmov 1.0  }
 0x188   : > { %1731 = vmatpush.bf16.msra.mxu2 %v3014_v0  ;;  %1745 = vmatpush.bf16.msra.mxu3 %v3016_v1  ;;  %v598_v48 = vpop.permute.xlu0 %597 }
 0x189   : > { %vm387_vm5 = vcmp.eq.s32.totalorder %v3548_v21, 0  ;;  %vm580_vm6 = vcmp.lt.s32.totalorder %v3548_v21, 1  ;;  %vm391_vm7 = vcmp.eq.s32.totalorder %v3548_v21, 127  ;;  %vm563_vm8 = vcmp.lt.s32.totalorder %v3548_v21, 127 }
 0x18a   : > { %v3569_v28 = vsel %vm387_vm5, 0.0, %v4097_v22  ;;  %vm401_vm9 = vcmp.lt.s32.totalorder %v3548_v21, 8  ;;  %vm1975_vm10 = vcmp.eq.s32.totalorder %v3548_v21, 1  ;;  %vm1979_vm11 = vcmp.eq.s32.totalorder %v3548_v21, 2 }
 0x18b   : > { %1704 = vmatpush.bf16.msra.mxu0 %v3020_v7  ;;  %1718 = vmatpush.bf16.msra.mxu1 %v3022_v8  ;;  %v730_v40 = vpop.permute.xlu1 %729 }
 0x18c   : > { %1732 = vmatpush.bf16.msra.mxu2 %v3026_v13  ;;  %1746 = vmatpush.bf16.msra.mxu3 %v3028_v14  ;;  %v735_v30 = vsel %vm580_vm6, %v730_v40, %v726_v15 }
 0x18d   : > { %v1393_v42 = vpop.f32.mrf.mxu2  ;;  %v1407_v3 = vpop.f32.mrf.mxu3 }
 0x18e   : > { %v3571_v52 = vadd.f32 %v1407_v3, %v1393_v42  ;;  %v1421_v37 = vpop.f32.mrf.mxu0  ;;  %v1435_v46 = vpop.f32.mrf.mxu1  ;;  %v601_v42 = vsel %vm580_vm6, %v594_v18, %v598_v48  ;;  %v603_v3 = vsel %vm580_vm6, %v598_v48, %v594_v18  ;;  %v3602_v48 = vmul.f32 %v735_v30, %v3569_v28  ;;  %v4101_v18 = vld [vmem:[#allocation33_spill] sm:$0xff] }
 0x18f   : > { %1705 = vmatpush.bf16.msra.mxu0 %v3032_v19  ;;  %1719 = vmatpush.bf16.msra.mxu1 %v3034_v20  ;;  %v1436_v25 = vadd.f32 %v1435_v46, %v1421_v37  ;;  %v3585_v60 = vpop.permute.xlu2 %555  ;;  %v605_v32 = vmul.f32 %v603_v3, %v3569_v28  ;;  %v606_v37 = vmul.f32 %v601_v42, %v3569_v28 }
 0x190   : > { %1733 = vmatpush.bf16.msra.mxu2 %v3038_v26  ;;  %1747 = vmatpush.bf16.msra.mxu3 %v3040_v27  ;;  %v733_v46 = vsel %vm580_vm6, %v726_v15, %v730_v40  ;;  %4100 = vst [vmem:[#allocation42_spill] sm:$0xff] %v3602_v48  ;;  %v609_v40 = vmul.f32 2.0, %v4101_v18  ;;  %v1700_v3 = vpack.c.bf16 %v3516_v36, %v3494_v63  ;;  %v3617_v48 = vsel %vm391_vm7, 0.0, %v4097_v22 }
 0x191   : > { %v3588_v55 = vsub.f32 %v1436_v25, %v3575_v29  ;;  %v3597_v33 = vmul.f32 %v733_v46, %v3569_v28  ;;  %v610_v25 = vmul.f32 2.0, %v3262_v31  ;;  %v3614_v30 = vmul.f32 %v3545_v57, %v3545_v57 }
 0x192   : > { %v1701_v31 = vpack.c.bf16 %v3518_v11, %v3496_v10  ;;  %v3623_v18 = vmul.f32 %v3552_v2, %v3552_v2  ;;  %v613_v22 = vadd.f32 %v609_v40, %v605_v32  ;;  %v573_v11 = vpop.permute.xlu0 %572 }
 0x193   : > { %1706 = vmatpush.bf16.msra.mxu0 %v3044_v34  ;;  %1720 = vmatpush.bf16.msra.mxu1 %v3046_v35  ;;  %4098 = vst [vmem:[#allocation40_spill] sm:$0xff] %v3588_v55 }
 0x194   : > { %1734 = vmatpush.bf16.msra.mxu2 %v3050_v50  ;;  %1748 = vmatpush.bf16.msra.mxu3 %v3052_v54  ;;  %4099 = vst [vmem:[#allocation41_spill] sm:$0xff] %v3597_v33 }
 0x195   : > { %v1449_v15 = vpop.f32.mrf.mxu2  ;;  %v1463_v42 = vpop.f32.mrf.mxu3 }
 0x196   : > { %v1464_v46 = vadd.f32 %v1463_v42, %v1449_v15  ;;  %v1423_v55 = vpop.f32.mrf.mxu0  ;;  %v1437_v33 = vpop.f32.mrf.mxu1  ;;  %v614_v15 = vadd.f32 %v610_v25, %v606_v37 }
 0x197   : > { %1707 = vmatpush.bf16.msra.mxu0 %v3060_v61  ;;  %1721 = vmatpush.bf16.msra.mxu1 %v3062_v62  ;;  %v1438_v63 = vadd.f32 %v1437_v33, %v1423_v55  ;;  %v622_v42 = vpop.permute.xlu2 %621 }
 0x198   : > { %1735 = vmatpush.bf16.msra.mxu2 %v3070_v6  ;;  %1749 = vmatpush.bf16.msra.mxu3 %v3072_v9  ;;  %v3630_v36 = vsub.f32 %v1464_v46, %v3614_v30  ;;  %v625_v55 = vsel %vm563_vm8, %v3554_v43, %v622_v42  ;;  %v627_v33 = vsel %vm563_vm8, %v622_v42, %v3554_v43 }
 0x199   : > { %v3635_v10 = vsub.f32 %v1438_v63, %v3623_v18  ;;  %v629_v32 = vmul.f32 %v625_v55, %v3617_v48 }
 0x19b   : > { %1708 = vmatpush.bf16.msra.mxu0 %v3076_v4  ;;  %1722 = vmatpush.bf16.msra.mxu1 %v3078_v16  ;;  %v3647_v37 = vadd.f32 %v629_v32, %v613_v22 }
 0x19c   : > { %1736 = vmatpush.bf16.msra.mxu2 %v3082_v23  ;;  %1750 = vmatpush.bf16.msra.mxu3 %v3084_v24 }
 0x19d   : > { %v1451_v43 = vpop.f32.mrf.mxu2  ;;  %v1465_v25 = vpop.f32.mrf.mxu3 }
 0x19e   : > { %v1466_v40 = vadd.f32 %v1465_v25, %v1451_v43 }
 0x19f   : > { %1709 = vmatpush.bf16.msra.mxu0 %v3088_v39  ;;  %1723 = vmatpush.bf16.msra.mxu1 %v3090_v45  ;;  %v1479_v46 = vpop.f32.mrf.mxu0 }
 0x1a0   : > { %1737 = vmatpush.bf16.msra.mxu2 %v3094_v47  ;;  %1751 = vmatpush.bf16.msra.mxu3 %v3096_v49 }
 0x1a2   : > { %1710 = vmatmul.bf16.vlgmr.msra.gmra.mxu0 %v1700_v3  ;;  %1724 = vmatmul.bf16.vlgmr.msra.gmra.mxu1 %v1701_v31 }
 0x1a3   : > { %1760 = vmatpush.bf16.msrb.mxu0 %v2990_v41  ;;  %1774 = vmatpush.bf16.msrb.mxu1 %v2992_v44  ;;  %v630_v41 = vmul.f32 %v627_v33, %v3617_v48  ;;  %v577_v44 = vpop.permute.xlu1 %576 }
 0x1a4   : > { %1788 = vmatpush.bf16.msrb.mxu2 %v2994_v51  ;;  %1802 = vmatpush.bf16.msrb.mxu3 %v2996_v53  ;;  %v3655_v53 = vmul.f32 %v3571_v52, %v3571_v52  ;;  %v583_v63 = vsel %vm580_vm6, %v577_v44, %v573_v11 }
 0x1a5   : > { %1738 = vmatmul.bf16.vlgmr.msra.gmra.mxu2 %v1700_v3  ;;  %1752 = vmatmul.bf16.vlgmr.msra.gmra.mxu3 %v1701_v31  ;;  %v3651_v51 = vadd.f32 %v630_v41, %v614_v15  ;;  %v581_v31 = vsel %vm580_vm6, %v573_v11, %v577_v44 }
 0x1a6   : > { %v3660_v3 = vsub.f32 %v1466_v40, %v3655_v53  ;;  %v586_v11 = vmul.f32 %v581_v31, %v3569_v28 }
 0x1a7   : > { %1761 = vmatpush.bf16.msrb.mxu0 %v3004_v58  ;;  %1775 = vmatpush.bf16.msrb.mxu1 %v3006_v59  ;;  %v1493_v58 = vpop.f32.mrf.mxu1  ;;  %v1481_v40 = vpop.f32.mrf.mxu0  ;;  %v642_v31 = vand.u32 2147483647, %v3651_v51 }
 0x1a8   : > { %1789 = vmatpush.bf16.msrb.mxu2 %v3014_v0  ;;  %1803 = vmatpush.bf16.msrb.mxu3 %v3016_v1  ;;  %v1494_v59 = vadd.f32 %v1493_v58, %v1479_v46  ;;  %v600_v0 = vpop.permute.xlu0 %599  ;;  %v1507_v43 = vpop.f32.mrf.mxu2 }
 0x1a9   : > { %v602_v1 = vsel %vm580_vm6, %v3558_v5, %v600_v0  ;;  %v1521_v25 = vpop.f32.mrf.mxu3 }
 0x1aa   : > { %v3676_v22 = vmul.f32 %v1494_v59, %v1494_v59  ;;  %v3679_v15 = vmul.f32 %v1494_v59, %v3536_v38 }
 0x1ab   : > { %1762 = vmatpush.bf16.msrb.mxu0 %v3020_v7  ;;  %1776 = vmatpush.bf16.msrb.mxu1 %v3022_v8  ;;  %v604_v7 = vsel %vm580_vm6, %v600_v0, %v3558_v5  ;;  %v560_v8 = vpop.permute.xlu2 %559  ;;  %v694_v32 = vpop.permute.xlu1 %693 }
 0x1ac   : > { %1790 = vmatpush.bf16.msrb.mxu2 %v3026_v13  ;;  %1804 = vmatpush.bf16.msrb.mxu3 %v3028_v14  ;;  %v3682_v42 = vmul.f32 %v604_v7, %v3569_v28  ;;  %v3685_v13 = vmul.f32 %v602_v1, %v3569_v28  ;;  %v585_v14 = vmul.f32 %v583_v63, %v3569_v28 }
 0x1ad   : > { %v564_v5 = vsel %vm563_vm8, %v3585_v60, %v560_v8  ;;  %v566_v55 = vsel %vm563_vm8, %v560_v8, %v3585_v60  ;;  %v3697_v33 = vadd.f32 %v3676_v22, %v3575_v29  ;;  %v1522_v60 = vadd.f32 %v1521_v25, %v1507_v43 }
 0x1ae   : > { %v568_v41 = vmul.f32 %v564_v5, %v3617_v48  ;;  %v569_v44 = vmul.f32 %v566_v55, %v3617_v48 }
 0x1af   : > { %1763 = vmatpush.bf16.msrb.mxu0 %v3032_v19  ;;  %1777 = vmatpush.bf16.msrb.mxu1 %v3034_v20  ;;  %v1495_v46 = vpop.f32.mrf.mxu1  ;;  %v641_v20 = vand.u32 2147483647, %v3647_v37 }
 0x1b0   : > { %1791 = vmatpush.bf16.msrb.mxu2 %v3038_v26  ;;  %1805 = vmatpush.bf16.msrb.mxu3 %v3040_v27  ;;  %v589_v58 = vsub.f32 %v568_v41, %v585_v14  ;;  %v590_v59 = vsub.f32 %v569_v44, %v586_v11  ;;  %v1496_v19 = vadd.f32 %v1495_v46, %v1481_v40  ;;  %v690_v51 = vpop.permute.xlu0 %689  ;;  %v1509_v8 = vpop.f32.mrf.mxu2  ;;  %v4104_v44 = vld [vmem:[#allocation34_spill] sm:$0xff] }
 0x1b1   : > { %v3710_v26 = vmul.f32 %v1522_v60, %v1522_v60  ;;  %v3713_v27 = vmul.f32 %v1522_v60, %v3545_v57  ;;  %v1523_v14 = vpop.f32.mrf.mxu3  ;;  %v742_v43 = vmul.f32 2.0, %v4104_v44 }
 0x1b2   : > { %v637_v63 = vand.u32 2147483647, %v589_v58  ;;  %v3716_v0 = vmul.f32 %v1496_v19, %v1496_v19  ;;  %v1524_v11 = vadd.f32 %v1523_v14, %v1509_v8  ;;  %v4105_v58 = vld [vmem:[#allocation42_spill] sm:$0xff] }
 0x1b3   : > { %1764 = vmatpush.bf16.msrb.mxu0 %v3044_v34  ;;  %1778 = vmatpush.bf16.msrb.mxu1 %v3046_v35  ;;  %v3719_v34 = vmul.f32 %v1496_v19, %v3552_v2  ;;  %v3723_v35 = vadd.f32 %v3710_v26, %v3614_v30  ;;  %v706_v37 = vpop.permute.xlu2 %705  ;;  %v3737_v5 = vpop.permute.xlu1 %727  ;;  %v4106_v19 = vld [vmem:[#allocation41_spill] sm:$0xff] }
 0x1b4   : > { %1792 = vmatpush.bf16.msrb.mxu2 %v3050_v50  ;;  %1806 = vmatpush.bf16.msrb.mxu3 %v3052_v54  ;;  %v638_v50 = vand.u32 2147483647, %v590_v59  ;;  %v3727_v54 = vadd.f32 %v3716_v0, %v3623_v18  ;;  %v3731_v1 = vadd.f32 %v641_v20, %v637_v63  ;;  %v746_v20 = vadd.f32 %v742_v43, %v4106_v19 }
 0x1b6   : > { %v3735_v7 = vadd.f32 %v642_v31, %v638_v50 }
 0x1b7   : > { %1765 = vmatpush.bf16.msrb.mxu0 %v3060_v61  ;;  %1779 = vmatpush.bf16.msrb.mxu1 %v3062_v62  ;;  %v3743_v61 = vmul.f32 %v1524_v11, %v1524_v11  ;;  %v3746_v62 = vmul.f32 %v1524_v11, %v3571_v52 }
 0x1b8   : > { %1793 = vmatpush.bf16.msrb.mxu2 %v3070_v6  ;;  %1807 = vmatpush.bf16.msrb.mxu3 %v3072_v9  ;;  %v1758_v9 = vpack.c.bf16 %v3530_v17, %v3507_v12  ;;  %v710_v55 = vpop.permute.xlu0 %709  ;;  %v4103_v17 = vld [vmem:[#allocation32_spill] sm:$0xff] }
 0x1b9   : > { %v3750_v6 = vadd.f32 %v3743_v61, %v3655_v53  ;;  %v715_v12 = vsel %vm580_vm6, %v710_v55, %v706_v37  ;;  %v741_v41 = vmul.f32 2.0, %v4103_v17 }
 0x1bb   : > { %1766 = vmatpush.bf16.msrb.mxu0 %v3076_v4  ;;  %1780 = vmatpush.bf16.msrb.mxu1 %v3078_v16  ;;  %v4102_v4 = vld [vmem:[#allocation39_spill] sm:$0xff]  ;;  %v745_v59 = vadd.f32 %v741_v41, %v4105_v58 }
 0x1bc   : > { %1794 = vmatpush.bf16.msrb.mxu2 %v3082_v23  ;;  %1808 = vmatpush.bf16.msrb.mxu3 %v3084_v24  ;;  %v1759_v16 = vpack.c.bf16 %v4102_v4, %v3509_v56  ;;  %v3760_v23 = vpop.permute.xlu2 %731  ;;  %v697_v24 = vsel %vm563_vm8, %v690_v51, %v694_v32  ;;  %v754_v56 = vpop.permute.xlu1 %753 }
 0x1bf   : > { %1767 = vmatpush.bf16.msrb.mxu0 %v3088_v39  ;;  %1781 = vmatpush.bf16.msrb.mxu1 %v3090_v45  ;;  %v699_v39 = vsel %vm563_vm8, %v694_v32, %v690_v51  ;;  %v713_v45 = vsel %vm580_vm6, %v706_v37, %v710_v55  ;;  %v1537_v60 = vpop.f32.mrf.mxu0  ;;  %v1551_v40 = vpop.f32.mrf.mxu1 }
 0x1c0   : > { %1795 = vmatpush.bf16.msrb.mxu2 %v3094_v47  ;;  %1809 = vmatpush.bf16.msrb.mxu3 %v3096_v49  ;;  %v701_v47 = vmul.f32 %v697_v24, %v3617_v48  ;;  %v717_v49 = vmul.f32 %v715_v12, %v3569_v28  ;;  %v702_v25 = vmul.f32 %v699_v39, %v3617_v48  ;;  %v750_v50 = vpop.permute.xlu0 %749  ;;  %v1864_v12 = vadd.f32 0.0001, %v3697_v33 }
 0x1c1   : > { %v718_v32 = vmul.f32 %v713_v45, %v3569_v28  ;;  %v1552_v31 = vadd.f32 %v1551_v40, %v1537_v60  ;;  %v757_v37 = vsel %vm563_vm8, %v750_v50, %v754_v56  ;;  %v759_v51 = vsel %vm563_vm8, %v754_v56, %v750_v50 }
 0x1c2   : > { %1768 = vmatmul.bf16.vlgmr.msrb.gmra.mxu0 %v1758_v9  ;;  %1782 = vmatmul.bf16.vlgmr.msrb.gmra.mxu1 %v1759_v16  ;;  %v721_v46 = vsub.f32 %v701_v47, %v717_v49  ;;  %v761_v11 = vmul.f32 %v757_v37, %v3617_v48 }
 0x1c3   : > { %1796 = vmatmul.bf16.vlgmr.msrb.gmra.mxu2 %v1758_v9  ;;  %1810 = vmatmul.bf16.vlgmr.msrb.gmra.mxu3 %v1759_v16  ;;  %v722_v63 = vsub.f32 %v702_v25, %v718_v32  ;;  %v1832_v14 = vsub.f32 %v1552_v31, %v3676_v22  ;;  %v762_v9 = vmul.f32 %v759_v51, %v3617_v48  ;;  %v4107_v16 = vld [vmem:[#allocation40_spill] sm:$0xff] }
 0x1c4   : > { %v558_v8 = vpop.permute.xlu2 %557  ;;  %v769_v4 = vand.u32 2147483647, %v721_v46  ;;  %v765_v39 = vadd.f32 %v761_v11, %v745_v59  ;;  %v575_v47 = vpop.permute.xlu1 %574 }
 0x1c5   : > { %v1868_v24 = vadd.f32 %v1832_v14, %v4107_v16  ;;  %v770_v55 = vand.u32 2147483647, %v722_v63  ;;  %v766_v45 = vadd.f32 %v762_v9, %v746_v20  ;;  %v2679_v63 = vmov 0.0  }
 0x1c6   : > { %v773_v56 = vand.u32 2147483647, %v765_v39  ;;  %v403_v50 = vsel %vm401_vm9, 1.0, %v2679_v63  ;;  %v1865_v14 = vadd.f32 0.0001, %v3723_v35 }
 0x1c7   : > { %v1872_v49 = vadd.f32 0.0009, %v1868_v24  ;;  %v774_v44 = vand.u32 2147483647, %v766_v45  ;;  %v1539_v22 = vpop.f32.mrf.mxu0  ;;  %v1553_v25 = vpop.f32.mrf.mxu1  ;;  %v405_v45 = vmul.f32 0.25, %v403_v50  ;;  %v3832_v50 = vmul.f32 2.0, %v3713_v27 }
 0x1c8   : > { %v1565_v17 = vpop.f32.mrf.mxu2  ;;  %v1579_v41 = vpop.f32.mrf.mxu3  ;;  %v1554_v60 = vadd.f32 %v1553_v25, %v1539_v22  ;;  %v3789_v40 = vadd.f32 %v773_v56, %v769_v4  ;;  %v4109_v22 = vld [vmem:[#allocation36_spill] sm:$0xff] }
 0x1c9   : > { %v1580_v43 = vadd.f32 %v1579_v41, %v1565_v17  ;;  %v3787_v32 = vmul.f32 %v1872_v49, %v1864_v12  ;;  %v3791_v46 = vadd.f32 %v774_v44, %v770_v55  ;;  %v562_v51 = vpop.permute.xlu0 %561  ;;  %v4108_v12 = vld [vmem:[#allocation35_spill] sm:$0xff]  ;;  %v612_v25 = vmul.f32 2.0, %v4109_v22 }
 0x1ca   : > { %v1834_v59 = vsub.f32 %v1554_v60, %v3716_v0  ;;  %v781_v19 = vmax.f32 %v3731_v1, %v3789_v40  ;;  %v565_v0 = vsel %vm563_vm8, %v558_v8, %v562_v51  ;;  %v611_v49 = vmul.f32 2.0, %v4108_v12 }
 0x1cb   : > { %v1833_v33 = vsub.f32 %v1580_v43, %v3710_v26  ;;  %v782_v20 = vmax.f32 %v3735_v7, %v3791_v46  ;;  %v1866_v26 = vadd.f32 0.0001, %v3727_v54  ;;  %v567_v7 = vsel %vm563_vm8, %v562_v51, %v558_v8 }
 0x1cc   : > { %v579_v58 = vpop.permute.xlu2 %578  ;;  %v1870_v37 = vadd.f32 %v1834_v59, %v3635_v10  ;;  %v624_v54 = vpop.permute.xlu1 %623  ;;  %v570_v41 = vmul.f32 %v565_v0, %v3617_v48  ;;  %v571_v8 = vmul.f32 %v567_v7, %v3617_v48  ;;  %v3825_v46 = vmul.f32 0.0078125, %v405_v45  ;;  %v4112_v7 = vld [vmem:[#allocation30_spill] sm:$0xff] }
 0x1cd   : > { %v1869_v31 = vadd.f32 %v1833_v33, %v3630_v36  ;;  %v582_v24 = vsel %vm580_vm6, %v575_v47, %v579_v58  ;;  %v584_v55 = vsel %vm580_vm6, %v579_v58, %v575_v47  ;;  %v1840_v47 = vmul.f32 2.0, %v3679_v15 }
 0x1ce   : > { %v1874_v9 = vadd.f32 0.0009, %v1870_v37  ;;  %v587_v44 = vmul.f32 %v584_v55, %v3569_v28  ;;  %v588_v43 = vmul.f32 %v582_v24, %v3569_v28  ;;  %v615_v33 = vadd.f32 %v611_v49, %v3682_v42  ;;  %v4113_v24 = vld [vmem:[#allocation26_spill] sm:$0xff] }
 0x1cf   : > { %v1873_v11 = vadd.f32 0.0009, %v1869_v31  ;;  %v1867_v58 = vadd.f32 0.0001, %v3750_v6  ;;  %v3829_v63 = vadd.f32 0.0001, %v1840_v47  ;;  %v616_v37 = vadd.f32 %v612_v25, %v3685_v13 }
 0x1d0   : > { %v1567_v1 = vpop.f32.mrf.mxu2  ;;  %v1581_v4 = vpop.f32.mrf.mxu3  ;;  %v3815_v17 = vmul.f32 %v1874_v9, %v1866_v26  ;;  %v591_v59 = vsub.f32 %v570_v41, %v587_v44  ;;  %v592_v31 = vsub.f32 %v571_v8, %v588_v43  ;;  %v734_v51 = vsel %vm580_vm6, %v3737_v5, %v3760_v23  ;;  %v4110_v9 = vld [vmem:[#allocation28_spill] sm:$0xff]  ;;  %v4117_v43 = vld [vmem:[#allocation21_spill] sm:$0xff] }
 0x1d1   : > { %v3812_v39 = vmul.f32 %v1873_v11, %v1865_v14  ;;  %v1582_v35 = vadd.f32 %v1581_v4, %v1567_v1  ;;  %v620_v14 = vpop.permute.xlu0 %619  ;;  %v736_v42 = vsel %vm580_vm6, %v3760_v23, %v3737_v5  ;;  %v4111_v1 = vld [vmem:[#allocation23_spill] sm:$0xff]  ;;  %v486_v55 = vmax.f32 %v4113_v24, %v4112_v7  ;;  %v4115_v23 = vld [vmem:[#allocation38_spill] sm:$0xff] }
 0x1d2   : > { %v626_v26 = vsel %vm563_vm8, %v620_v14, %v624_v54  ;;  %v628_v11 = vsel %vm563_vm8, %v624_v54, %v620_v14  ;;  %v485_v4 = vmax.f32 %v4111_v1, %v4110_v9  ;;  %v744_v45 = vmul.f32 2.0, %v4115_v23  ;;  %v4116_v54 = vld [vmem:[#allocation20_spill] sm:$0xff]  ;;  %v4122_v9 = vld [vmem:[#allocation22_spill] sm:$0xff] }
 0x1d3   : > { %v1835_v56 = vsub.f32 %v1582_v35, %v3743_v61  ;;  %v631_v13 = vmul.f32 %v626_v26, %v3617_v48  ;;  %v632_v0 = vmul.f32 %v628_v11, %v3617_v48  ;;  %v4114_v35 = vld [vmem:[#allocation37_spill] sm:$0xff]  ;;  %v639_v12 = vand.u32 2147483647, %v591_v59 }
 0x1d4   : > { %v692_v60 = vpop.permute.xlu2 %691  ;;  %v743_v5 = vmul.f32 2.0, %v4114_v35  ;;  %v640_v49 = vand.u32 2147483647, %v592_v31  ;;  %v708_v41 = vpop.permute.xlu1 %707  ;;  %v785_v44 = vsub.f32 %v4116_v54, %v781_v19  ;;  %v786_v47 = vsub.f32 %v4117_v43, %v782_v20 }
 0x1d5   : > { %v1871_v40 = vadd.f32 %v1835_v56, %v3660_v3  ;;  %v635_v56 = vadd.f32 %v631_v13, %v615_v33  ;;  %v636_v8 = vadd.f32 %v632_v0, %v616_v37  ;;  %v739_v22 = vmul.f32 %v736_v42, %v3569_v28  ;;  %v4120_v42 = vld [vmem:[#allocation31_spill] sm:$0xff] }
 0x1d6   : > { %v740_v25 = vmul.f32 %v734_v51, %v3569_v28  ;;  %v489_v14 = vsub.f32 %v4116_v54, %v485_v4  ;;  %v789_v31 = vand.u32 2147483647, %v785_v44  ;;  %v490_v33 = vsub.f32 %v4117_v43, %v486_v55  ;;  %v4121_v0 = vld [vmem:[#allocation27_spill] sm:$0xff]  ;;  %v4123_v44 = vld [vmem:[#allocation25_spill] sm:$0xff] }
 0x1d7   : > { %v1875_v61 = vadd.f32 0.0009, %v1871_v40  ;;  %v4118_v40 = vld [vmem:[#allocation29_spill] sm:$0xff]  ;;  %v643_v26 = vand.u32 2147483647, %v635_v56  ;;  %v488_v51 = vmax.f32 %v4121_v0, %v4120_v42  ;;  %2426 = vrcp.f32 %v3787_v32 }
 0x1d8   : > { %v644_v11 = vand.u32 2147483647, %v636_v8  ;;  %v790_v20 = vand.u32 2147483647, %v786_v47  ;;  %v793_v8 = vmul.f32 %v789_v31, %v3825_v46  ;;  %v493_v47 = vand.u32 2147483647, %v489_v14 }
 0x1d9   : > { %v3843_v6 = vmul.f32 %v1875_v61, %v1867_v58  ;;  %v4119_v58 = vld [vmem:[#allocation24_spill] sm:$0xff]  ;;  %v3871_v7 = vadd.f32 %v643_v26, %v639_v12  ;;  %v696_v35 = vpop.permute.xlu0 %695  ;;  %v492_v43 = vsub.f32 %v4123_v44, %v488_v51  ;;  %v1842_v14 = vmul.f32 2.0, %v3719_v34 }
 0x1da   : > { %v487_v61 = vmax.f32 %v4119_v58, %v4118_v40  ;;  %v3873_v24 = vadd.f32 %v644_v11, %v640_v49  ;;  %v698_v55 = vsel %vm563_vm8, %v692_v60, %v696_v35  ;;  %v700_v23 = vsel %vm563_vm8, %v696_v35, %v692_v60 }
 0x1db   : > { %v703_v32 = vmul.f32 %v698_v55, %v3617_v48  ;;  %v794_v49 = vmul.f32 %v790_v20, %v3825_v46  ;;  %v494_v40 = vand.u32 2147483647, %v490_v33  ;;  %v704_v60 = vmul.f32 %v700_v23, %v3617_v48 }
 0x1dc   : > { %v712_v59 = vpop.permute.xlu2 %711  ;;  %v491_v1 = vsub.f32 %v4122_v9, %v487_v61  ;;  %v756_v11 = vpop.permute.xlu1 %755  ;;  %v747_v33 = vadd.f32 %v743_v5, %v739_v22  ;;  %2428 = vrcp.f32 %v3812_v39 }
 0x1dd   : > { %v716_v19 = vsel %vm580_vm6, %v712_v59, %v708_v41  ;;  %v714_v56 = vsel %vm580_vm6, %v708_v41, %v712_v59  ;;  %v3889_v26 = vadd.f32 %v794_v49, %v793_v8  ;;  %v497_v59 = vmul.f32 %v493_v47, %v3825_v46 }
 0x1de   : > { %v719_v12 = vmul.f32 %v716_v19, %v3569_v28  ;;  %v495_v58 = vand.u32 2147483647, %v491_v1  ;;  %v720_v41 = vmul.f32 %v714_v56, %v3569_v28  ;;  %v498_v31 = vmul.f32 %v494_v40, %v3825_v46 }
 0x1df   : > { %v1595_v37 = vpop.f32.mrf.mxu0  ;;  %v1609_v13 = vpop.f32.mrf.mxu1  ;;  %v748_v19 = vadd.f32 %v744_v45, %v740_v25  ;;  %2430 = vrcp.f32 %v3815_v17 }
 0x1e0   : > { %v1610_v4 = vadd.f32 %v1609_v13, %v1595_v37  ;;  %v499_v37 = vmul.f32 %v495_v58, %v3825_v46  ;;  %v2427_v13 = vpop.eup %2426  ;;  %v501_v55 = vadd.f32 %v498_v31, %v497_v59  ;;  %2432 = vrcp.f32 %v3843_v6 }
 0x1e1   : > { %v752_v8 = vpop.permute.xlu0 %751 }
 0x1e2   : > { %v1836_v54 = vsub.f32 %v1610_v4, %v3679_v15  ;;  %v496_v15 = vand.u32 2147483647, %v492_v43  ;;  %v723_v4 = vsub.f32 %v703_v32, %v719_v12  ;;  %v758_v45 = vsel %vm563_vm8, %v752_v8, %v756_v11 }
 0x1e3   : > { %v760_v22 = vsel %vm563_vm8, %v756_v11, %v752_v8  ;;  %v502_v25 = vadd.f32 %v501_v55, %v499_v37  ;;  %v763_v39 = vmul.f32 %v758_v45, %v3617_v48 }
 0x1e4   : > { %v1848_v61 = vmul.f32 2.0, %v1836_v54  ;;  %v500_v35 = vmul.f32 %v496_v15, %v3825_v46  ;;  %v724_v54 = vsub.f32 %v704_v60, %v720_v41  ;;  %v771_v43 = vand.u32 2147483647, %v723_v4  ;;  %v2429_v15 = vpop.eup %2428 }
 0x1e5   : > { %v767_v40 = vadd.f32 %v763_v39, %v747_v33  ;;  %v1845_v60 = vadd.f32 0.0001, %v3832_v50  ;;  %v1846_v41 = vadd.f32 0.0001, %v1842_v14  ;;  %v1843_v33 = vmul.f32 2.0, %v3746_v62 }
 0x1e6   : > { %v1852_v20 = vadd.f32 0.0009, %v1848_v61  ;;  %v772_v61 = vand.u32 2147483647, %v724_v54 }
 0x1e7   : > { %v1597_v28 = vpop.f32.mrf.mxu0  ;;  %v1611_v1 = vpop.f32.mrf.mxu1  ;;  %v775_v37 = vand.u32 2147483647, %v767_v40 }
 0x1e8   : > { %v1623_v42 = vpop.f32.mrf.mxu2  ;;  %v1637_v0 = vpop.f32.mrf.mxu3  ;;  %v1856_v23 = vmul.f32 %v1852_v20, %v3829_v63  ;;  %v1612_v56 = vadd.f32 %v1611_v1, %v1597_v28  ;;  %v764_v63 = vmul.f32 %v760_v22, %v3617_v48 }
 0x1e9   : > { %v1638_v51 = vadd.f32 %v1637_v0, %v1623_v42  ;;  %v779_v42 = vadd.f32 %v775_v37, %v771_v43 }
 0x1ea   : > { %v3903_v32 = vmul.f32 %v2427_v13, %v1856_v23  ;;  %v1838_v12 = vsub.f32 %v1612_v56, %v3719_v34  ;;  %v768_v58 = vadd.f32 %v764_v63, %v748_v19  ;;  %v1847_v23 = vadd.f32 0.0001, %v1843_v33 }
 0x1eb   : > { %v1837_v5 = vsub.f32 %v1638_v51, %v3713_v27  ;;  %v503_v27 = vadd.f32 %v502_v25, %v500_v35  ;;  %v2431_v51 = vpop.eup %2430  ;;  %v783_v28 = vmax.f32 %v3871_v7, %v779_v42 }
 0x1ec   : > { %v1850_v47 = vmul.f32 2.0, %v1838_v12  ;;  %v776_v48 = vand.u32 2147483647, %v768_v58  ;;  %v2433_v45 = vpop.eup %2432 }
 0x1ed   : > { %v1849_v49 = vmul.f32 2.0, %v1837_v5  ;;  %504 = vadd.xlane.f32.xlu2 %v503_v27  ;;  %v787_v35 = vsub.f32 %v4122_v9, %v783_v28 }
 0x1ee   : > { %v1854_v34 = vadd.f32 0.0009, %v1850_v47  ;;  %v780_v0 = vadd.f32 %v776_v48, %v772_v61 }
 0x1ef   : > { %v1853_v11 = vadd.f32 0.0009, %v1849_v49  ;;  %v791_v8 = vand.u32 2147483647, %v787_v35 }
 0x1f0   : > { %v1625_v59 = vpop.f32.mrf.mxu2  ;;  %v1639_v31 = vpop.f32.mrf.mxu3  ;;  %v1858_v20 = vmul.f32 %v1854_v34, %v1846_v41  ;;  %v784_v1 = vmax.f32 %v3873_v24, %v780_v0 }
 0x1f1   : > { %v1857_v13 = vmul.f32 %v1853_v11, %v1845_v60  ;;  %v1640_v17 = vadd.f32 %v1639_v31, %v1625_v59 }
 0x1f2   : > { %v3915_v14 = vmul.f32 %v2431_v51, %v1858_v20  ;;  %v788_v55 = vsub.f32 %v4123_v44, %v784_v1 }
 0x1f3   : > { %v3911_v19 = vmul.f32 %v2429_v15, %v1857_v13  ;;  %v1839_v50 = vsub.f32 %v1640_v17, %v3746_v62  ;;  %v795_v62 = vmul.f32 %v791_v8, %v3825_v46 }
 0x1f4   : > { %v792_v54 = vand.u32 2147483647, %v788_v55 }
 0x1f5   : > { %v1851_v4 = vmul.f32 2.0, %v1839_v50  ;;  %v798_v7 = vadd.f32 %v3889_v26, %v795_v62 }
 0x1f6   : > { %v796_v6 = vmul.f32 %v792_v54, %v3825_v46 }
 0x1f7   : > { %v1855_v56 = vadd.f32 0.0009, %v1851_v4 }
 0x1f8   : > { %v799_v24 = vadd.f32 %v798_v7, %v796_v6 }
 0x1f9   : > { %v1859_v5 = vmul.f32 %v1855_v56, %v1847_v23 }
 0x1fa   : > { %800 = vadd.xlane.f32.xlu0 %v799_v24 }
 0x1fb   : > { %v3923_v22 = vmul.f32 %v2433_v45, %v1859_v5 }
 0x1ff   : > { %v1653_v25 = vpop.f32.mrf.mxu0  ;;  %v1667_v9 = vpop.f32.mrf.mxu1 }
 0x200   : > { %v1668_v49 = vadd.f32 %v1667_v9, %v1653_v25 }
 0x202   : > { %v1888_v43 = vmul.f32 %v1668_v49, %v1668_v49 }
 0x204   : > { %v1924_v41 = vadd.f32 %v1888_v43, %v3575_v29 }
 0x206   : > { %v1928_v59 = vadd.f32 0.0001, %v1924_v41 }
 0x207   : > { %v1655_v39 = vpop.f32.mrf.mxu0  ;;  %v1669_v63 = vpop.f32.mrf.mxu1 }
 0x208   : > { %v1681_v12 = vpop.f32.mrf.mxu2  ;;  %v1695_v44 = vpop.f32.mrf.mxu3  ;;  %v1670_v11 = vadd.f32 %v1669_v63, %v1655_v39 }
 0x209   : > { %v1696_v60 = vadd.f32 %v1695_v44, %v1681_v12 }
 0x20a   : > { %v1890_v31 = vmul.f32 %v1670_v11, %v1670_v11 }
 0x20b   : > { %v1889_v34 = vmul.f32 %v1696_v60, %v1696_v60 }
 0x20c   : > { %v1926_v29 = vadd.f32 %v1890_v31, %v3623_v18 }
 0x20d   : > { %v1925_v33 = vadd.f32 %v1889_v34, %v3614_v30 }
 0x20e   : > { %v1930_v56 = vadd.f32 0.0001, %v1926_v29 }
 0x20f   : > { %v1929_v35 = vadd.f32 0.0001, %v1925_v33 }
 0x210   : > { %v1683_v27 = vpop.f32.mrf.mxu2  ;;  %v1697_v47 = vpop.f32.mrf.mxu3 }
 0x211   : > { %v1698_v50 = vadd.f32 %v1697_v47, %v1683_v27  ;;  %v1893_v27 = vmul.f32 %v1696_v60, %v3545_v57 }
 0x213   : > { %v1891_v55 = vmul.f32 %v1698_v50, %v1698_v50 }
 0x215   : > { %v1927_v30 = vadd.f32 %v1891_v55, %v3655_v53  ;;  %v1894_v53 = vmul.f32 %v1670_v11, %v3552_v2 }
 0x217   : > { %v1931_v24 = vadd.f32 0.0001, %v1927_v30 }
 0x21f   : > { %v1711_v40 = vpop.f32.mrf.mxu0  ;;  %v1725_v58 = vpop.f32.mrf.mxu1 }
 0x220   : > { %v1726_v61 = vadd.f32 %v1725_v58, %v1711_v40 }
 0x222   : > { %v1896_v26 = vsub.f32 %v1726_v61, %v1888_v43 }
 0x224   : > { %v1932_v15 = vadd.f32 %v1896_v26, %v4107_v16 }
 0x226   : > { %v1936_v37 = vadd.f32 0.0009, %v1932_v15 }
 0x227   : > { %v1713_v20 = vpop.f32.mrf.mxu0  ;;  %v1727_v42 = vpop.f32.mrf.mxu1 }
 0x228   : > { %v1739_v48 = vpop.f32.mrf.mxu2  ;;  %v1753_v13 = vpop.f32.mrf.mxu3  ;;  %v1940_v0 = vmul.f32 %v1936_v37, %v1928_v59  ;;  %v1728_v51 = vadd.f32 %v1727_v42, %v1713_v20 }
 0x229   : > { %v1754_v17 = vadd.f32 %v1753_v13, %v1739_v48  ;;  %v1895_v13 = vmul.f32 %v1698_v50, %v3571_v52 }
 0x22a   : > { %v1898_v1 = vsub.f32 %v1728_v51, %v1890_v31  ;;  %2434 = vrcp.f32 %v1940_v0  ;;  %v1906_v31 = vmul.f32 2.0, %v1894_v53 }
 0x22b   : > { %v1897_v28 = vsub.f32 %v1754_v17, %v1889_v34  ;;  %v1905_v34 = vmul.f32 2.0, %v1893_v27 }
 0x22c   : > { %v1934_v4 = vadd.f32 %v1898_v1, %v3635_v10  ;;  %v1892_v10 = vmul.f32 %v1668_v49, %v3536_v38  ;;  %v1910_v20 = vadd.f32 0.0001, %v1906_v31 }
 0x22d   : > { %v1933_v16 = vadd.f32 %v1897_v28, %v3630_v36  ;;  %v1909_v11 = vadd.f32 0.0001, %v1905_v34 }
 0x22e   : > { %v1938_v8 = vadd.f32 0.0009, %v1934_v4  ;;  %v1904_v39 = vmul.f32 2.0, %v1892_v10  ;;  %v1907_v4 = vmul.f32 2.0, %v1895_v13 }
 0x22f   : > { %v1937_v23 = vadd.f32 0.0009, %v1933_v16 }
 0x230   : > { %v1741_v54 = vpop.f32.mrf.mxu2  ;;  %v1755_v5 = vpop.f32.mrf.mxu3  ;;  %v1942_v6 = vmul.f32 %v1938_v8, %v1930_v56  ;;  %v1908_v47 = vadd.f32 0.0001, %v1904_v39  ;;  %v1911_v50 = vadd.f32 0.0001, %v1907_v4 }
 0x231   : > { %v1941_v45 = vmul.f32 %v1937_v23, %v1929_v35  ;;  %v1756_v62 = vadd.f32 %v1755_v5, %v1741_v54  ;;  %v2435_v49 = vpop.eup %2434 }
 0x233   : > { %v1899_v7 = vsub.f32 %v1756_v62, %v1891_v55  ;;  %2436 = vrcp.f32 %v1941_v45 }
 0x234   : > { %2438 = vrcp.f32 %v1942_v6 }
 0x235   : > { %v1935_v18 = vadd.f32 %v1899_v7, %v3660_v3 }
 0x237   : > { %v1939_v25 = vadd.f32 0.0009, %v1935_v18 }
 0x239   : > { %v1943_v36 = vmul.f32 %v1939_v25, %v1931_v24  ;;  %v2437_v29 = vpop.eup %2436 }
 0x23a   : > { %v2439_v16 = vpop.eup %2438 }
 0x23b   : > { %2440 = vrcp.f32 %v1943_v36 }
 0x23f   : > { %v1769_v9 = vpop.f32.mrf.mxu0  ;;  %v1783_v12 = vpop.f32.mrf.mxu1 }
 0x240   : > { %v1784_v44 = vadd.f32 %v1783_v12, %v1769_v9 }
 0x241   : > { %v2441_v30 = vpop.eup %2440 }
 0x242   : > { %v1900_v63 = vsub.f32 %v1784_v44, %v1892_v10 }
 0x244   : > { %v1912_v43 = vmul.f32 2.0, %v1900_v63 }
 0x246   : > { %v1916_v40 = vadd.f32 0.0009, %v1912_v43  ;;  %v1797_v58 = vpop.f32.mrf.mxu2  ;;  %v1811_v3 = vpop.f32.mrf.mxu3 }
 0x247   : > { %v1812_v61 = vadd.f32 %v1811_v3, %v1797_v58  ;;  %v1771_v41 = vpop.f32.mrf.mxu0  ;;  %v1785_v26 = vpop.f32.mrf.mxu1 }
 0x248   : > { %v1920_v15 = vmul.f32 %v1916_v40, %v1908_v47  ;;  %v1786_v38 = vadd.f32 %v1785_v26, %v1771_v41 }
 0x249   : > { %v1901_v59 = vsub.f32 %v1812_v61, %v1893_v27 }
 0x24a   : > { %v1948_v37 = vmul.f32 %v2435_v49, %v1920_v15  ;;  %v1902_v48 = vsub.f32 %v1786_v38, %v1894_v53 }
 0x24b   : > { %v1913_v57 = vmul.f32 2.0, %v1901_v59 }
 0x24c   : > { %v1914_v60 = vmul.f32 2.0, %v1902_v48  ;;  %v1952_v2 = vadd.f32 %v1948_v37, %v3903_v32 }
 0x24d   : > { %v1917_v17 = vadd.f32 0.0009, %v1913_v57 }
 0x24e   : > { %v1918_v42 = vadd.f32 0.0009, %v1914_v60  ;;  %v1799_v0 = vpop.f32.mrf.mxu2  ;;  %v1813_v51 = vpop.f32.mrf.mxu3  ;;  %v1956_v54 = vmul.f32 %v1952_v2, %v3825_v46 }
 0x24f   : > { %v1921_v33 = vmul.f32 %v1917_v17, %v1909_v11  ;;  %v1814_v28 = vadd.f32 %v1813_v51, %v1799_v0 }
 0x250   : > { %v1922_v1 = vmul.f32 %v1918_v42, %v1910_v20 }
 0x251   : > { %v1949_v35 = vmul.f32 %v2437_v29, %v1921_v33  ;;  %v1903_v55 = vsub.f32 %v1814_v28, %v1895_v13 }
 0x252   : > { %v1950_v23 = vmul.f32 %v2439_v16, %v1922_v1 }
 0x253   : > { %v1915_v56 = vmul.f32 2.0, %v1903_v55  ;;  %v1953_v32 = vadd.f32 %v1949_v35, %v3911_v19 }
 0x254   : > { %v1954_v52 = vadd.f32 %v1950_v23, %v3915_v14 }
 0x255   : > { %v1919_v8 = vadd.f32 0.0009, %v1915_v56  ;;  %v1957_v5 = vmul.f32 %v1953_v32, %v3825_v46 }
 0x256   : > { %v1958_v45 = vmul.f32 %v1954_v52, %v3825_v46 }
 0x257   : > { %v1923_v62 = vmul.f32 %v1919_v8, %v1911_v50  ;;  %v1960_v6 = vadd.f32 %v1957_v5, %v1956_v54 }
 0x259   : > { %v1951_v7 = vmul.f32 %v2441_v30, %v1923_v62  ;;  %v1961_v18 = vadd.f32 %v1960_v6, %v1958_v45 }
 0x25b   : > { %v1955_v24 = vadd.f32 %v1951_v7, %v3923_v22 }
 0x25d   : > { %v1959_v25 = vmul.f32 %v1955_v24, %v3825_v46 }
 0x25f   : > { %v1962_v19 = vadd.f32 %v1961_v18, %v1959_v25 }
 0x260   : > { %v505_v14 = vpop.xlane.xlu2 %504 }
 0x261   : > { %1963 = vadd.xlane.f32.xlu1 %v1962_v19  ;;  %v506_v36 = vrot.slane %v505_v14, 4 }
 0x263   : > { %v507_v10 = vadd.f32 %v506_v36, %v505_v14 }
 0x265   : > { %v508_v9 = vrot.slane %v507_v10, 2 }
 0x267   : > { %v509_v12 = vadd.f32 %v508_v9, %v507_v10 }
 0x269   : > { %v510_v44 = vrot.slane %v509_v12, 1 }
 0x26b   : > { %v511_v39 = vadd.f32 %v510_v44, %v509_v12 }
 0x26d   : > { %2333 = vpush %v511_v39  ;;  %v801_v63 = vpop.xlane.xlu0 %800 }
 0x26e   : > { %v802_v43 = vrot.slane %v801_v63, 4 }
 0x270   : > { %v803_v27 = vadd.f32 %v802_v43, %v801_v63 }
 0x272   : > { %v804_v47 = vrot.slane %v803_v27, 2 }
 0x274   : > { %v805_v53 = vadd.f32 %v804_v47, %v803_v27 }
 0x276   : > { %v806_v40 = vrot.slane %v805_v53, 1 }
 0x278   : > { %v807_v22 = vadd.f32 %v806_v40, %v805_v53 }
 0x27a   : > { %2335 = vpush %v807_v22 }
 0x29e   : > { %s2334_s25 = spop %2333 }
 0x29f   : > { %v1976_v38 = vstv %s2334_s25 }
 0x2a0   : > { %v1977_v59 = vsel %vm1975_vm10, %v1976_v38, 0.0 }
 0x2ab   : > { %s2336_s27 = spop %2335 }
 0x2ac   : > { %v1980_v49 = vstv %s2336_s27 }
 0x2ad   : > { %v1981_v48 = vsel %vm1979_vm11, %v1980_v49, 0.0 }
 0x2d4   : > { %v1964_v46 = vpop.xlane.xlu1 %1963 }
 0x2d5   : > { %v1965_v58 = vrot.slane %v1964_v46, 4 }
 0x2d7   : > { %v1966_v3 = vadd.f32 %v1965_v58, %v1964_v46 }
 0x2d9   : > { %v1967_v61 = vrot.slane %v1966_v3, 2 }
 0x2db   : > { %v1968_v41 = vadd.f32 %v1967_v61, %v1966_v3 }
 0x2dd   : > { %v1969_v26 = vrot.slane %v1968_v41, 1 }
 0x2df   : > { %v1970_v15 = vadd.f32 %v1969_v26, %v1968_v41 }
 0x2e1   : > { %2337 = vpush %v1970_v15 }
 0x312   : > { %s2338_s10 = spop %2337 }
 0x313   : > { %v1973_v34 = vstv %s2338_s10 }
 0x314   : > { %v1974_v31 = vsel %vm387_vm5, %v1973_v34, 0.0 }
 0x315   : > { %v1978_v37 = vadd.f32 %v1977_v59, %v1974_v31 }
 0x317   : > { %v1982_v57 = vadd.f32 %v1981_v48, %v1978_v37 }
 0x319   : > { %1983 = vst [vmem:[%s357_s21] sm:$0x1] %v1982_v57 }
 0x31a   : > { %2619 = shalt.err (!%p2616_p2)
}
 0x31b   : > { %2353 = dma.vmem_to_hbm [thread:$0]  (%p2783_p7), %s1996_s7, 16, %s1998_s15, %s1985_s22  }
 0x31c PF: > { %s4125_s3 = sld [smem:[#allocation16_spill]]  ;;  %s2009_s23 = sand.u32 1, %s2654_s18  }
 0x31d   : > { %s2010_s29 = scalar_lea.sflag [#allocation4], %s2009_s23 }
 0x322   : > { %p4126_p10 = scmp.ge.s32.totalorder %s4125_s3, 2 }
 0x324   : > { %p2373_p13 = pnand %p4126_p10, %p2745_p6 }
 0x326   : > { %p2374_p0 = pneg %p2373_p13 }
 0x328   : > { %2649 = dma.done.wait (%p2374_p0), %s2010_s29, 16  }
 0x329   : > { %2651 = vsyncadd (%p2374_p0), %s2010_s29, 4294967280  ;;  %s4127_s21 = sld [smem:[#allocation18_spill]]  ;;  %s4129_s18 = smov %s2658_s19 }
 0x32a   : > { %s4128_s26 = sld [smem:[#allocation19_spill]]  ;;  %s4130_s19 = smov %s2662_s20 }
 0x32f   : > { %p22_p8 = scmp.ge.s32.totalorder %s4127_s21, 4  }
 0x330   : > { %s4131_s20 = smov %s4128_s26 }
 0x331   :  { %24 = sbr.rel (!%p22_p8) target bundleno = 12 (0xc), region = 117 }
 0x336   :  { %2015 = vsyncpa [#allocation3], 1 }
 0x337   :  { %2017 = vsyncpa [#allocation3 + $0x1], 1 }
 0x338   :  { %2018 = vsyncpa [#allocation6], 1 }
 0x339   :  { %2020 = vsyncpa [#allocation6 + $0x1], 1 }
 0x33a   :  { %2021 = vsyncpa [#allocation9], 1 }
 0x33b   :  { %2022 = vsyncpa [#allocation4], 1 }
 0x33c   :  { %2024 = vsyncpa [#allocation4 + $0x1], 1 }

</bundles_post_ra>
